<compile_context>
chip_gen: v5e
topology: v5e:2x2
jax: 0.10.0
libtpu: 0.0.40
codegen_flags: <defaults>
</compile_context>

<pallas_src>
import functools
import math

import jax
import jax.numpy as jnp
from jax.experimental import pallas as pl
from jax.experimental.pallas import tpu as pltpu


_VMEM_LIMIT = 48 * 1024 * 1024   # > 32 MiB default scoped limit, < v7x 64 MiB physical


# ---------------------------------------------------------------------------
# helpers
# ---------------------------------------------------------------------------
def _pick_tile(dim, target, align):
    """Largest tile <= target that is a multiple of `align` and divides `dim`;
    otherwise the full dim (full-extent blocks bypass the (8,128) divisibility rule)."""
    if dim <= target:
        return dim
    t = (target // align) * align
    while t >= align:
        if dim % t == 0:
            return t
        t -= align
    return dim


def _apply_act(y, activation):
    if activation == "gelu":
        return jax.nn.gelu(y)          # tanh approximation (see TODO above)
    if activation == "clamp":
        return jnp.clip(y, -1.0, 1.0)
    return y


# ---------------------------------------------------------------------------
# matmul (+ optional fused residual add, activation); Kt==1 fast path
# ---------------------------------------------------------------------------
def _matmul_k1_kernel(*refs, activation, has_add):
    if has_add:
        x_ref, w_ref, b_ref, add_ref, o_ref = refs
    else:
        x_ref, w_ref, b_ref, o_ref = refs
    y = jnp.dot(x_ref[...].astype(jnp.bfloat16), w_ref[...],
                preferred_element_type=jnp.float32) + b_ref[...]
    if has_add:
        y = y + add_ref[...]
    o_ref[...] = _apply_act(y, activation).astype(o_ref.dtype)


def _matmul_kt_kernel(*refs, activation, has_add):
    if has_add:
        x_ref, w_ref, b_ref, add_ref, o_ref, acc_ref = refs
    else:
        x_ref, w_ref, b_ref, o_ref, acc_ref = refs
    k = pl.program_id(2)

    @pl.when(k == 0)
    def _():
        acc_ref[...] = jnp.zeros_like(acc_ref)

    acc_ref[...] += jnp.dot(x_ref[...].astype(jnp.bfloat16), w_ref[...],
                            preferred_element_type=jnp.float32)

    @pl.when(k == pl.num_programs(2) - 1)
    def _():
        y = acc_ref[...] + b_ref[...]
        if has_add:
            y = y + add_ref[...]
        o_ref[...] = _apply_act(y, activation).astype(o_ref.dtype)


def linear(x, w, b, add=None, activation="none", out_dtype=jnp.float32,
           *, tm_target=256, tn_target=512, tk_target=512):
    M, K = x.shape
    N = w.shape[1]
    tm = _pick_tile(M, tm_target, 16)      # 16: bf16 sublane packing
    tn = _pick_tile(N, tn_target, 128)
    tk = _pick_tile(K, tk_target, 128)
    kt = K // tk
    has_add = add is not None
    args = [x, w, b] + ([add] if has_add else [])

    if kt == 1:
        # Single-K path: no accumulator scratch, no RMW (the common case).
        in_specs = [pl.BlockSpec((tm, K), lambda i, j: (i, 0)),
                    pl.BlockSpec((K, tn), lambda i, j: (0, j)),
                    pl.BlockSpec((1, tn), lambda i, j: (0, j))]
        if has_add:
            in_specs.append(pl.BlockSpec((tm, tn), lambda i, j: (i, j)))
        return pl.pallas_call(
            functools.partial(_matmul_k1_kernel, activation=activation, has_add=has_add),
            out_shape=jax.ShapeDtypeStruct((M, N), out_dtype),
            grid=(M // tm, N // tn),
            in_specs=in_specs,
            out_specs=pl.BlockSpec((tm, tn), lambda i, j: (i, j)),
            compiler_params=pltpu.CompilerParams(
                dimension_semantics=("parallel", "parallel"),
                vmem_limit_bytes=_VMEM_LIMIT),
        )(*args)

    in_specs = [pl.BlockSpec((tm, tk), lambda i, j, k: (i, k)),
                pl.BlockSpec((tk, tn), lambda i, j, k: (k, j)),
                pl.BlockSpec((1, tn), lambda i, j, k: (0, j))]
    if has_add:
        in_specs.append(pl.BlockSpec((tm, tn), lambda i, j, k: (i, j)))
    return pl.pallas_call(
        functools.partial(_matmul_kt_kernel, activation=activation, has_add=has_add),
        out_shape=jax.ShapeDtypeStruct((M, N), out_dtype),
        grid=(M // tm, N // tn, kt),
        in_specs=in_specs,
        out_specs=pl.BlockSpec((tm, tn), lambda i, j, k: (i, j)),
        scratch_shapes=[pltpu.VMEM((tm, tn), jnp.float32)],
        compiler_params=pltpu.CompilerParams(
            dimension_semantics=("parallel", "parallel", "arbitrary"),
            vmem_limit_bytes=_VMEM_LIMIT),
    )(*args)


# ---------------------------------------------------------------------------
# fused LayerNorm -> matmul (+ activation); LN cached across output tiles
# ---------------------------------------------------------------------------
def _ln_matmul_kernel(x_ref, g_ref, bln_ref, w_ref, b_ref, o_ref, xn_ref, *, activation):
    @pl.when(pl.program_id(1) == 0)       # recompute LN only once per row-tile
    def _():
        x = x_ref[...]
        mu = jnp.mean(x, axis=-1, keepdims=True)
        xc = x - mu
        var = jnp.mean(xc * xc, axis=-1, keepdims=True)
        xn_ref[...] = (xc * jax.lax.rsqrt(var + 1e-5) * g_ref[...]
                       + bln_ref[...]).astype(jnp.bfloat16)

    y = jnp.dot(xn_ref[...], w_ref[...], preferred_element_type=jnp.float32) + b_ref[...]
    o_ref[...] = _apply_act(y, activation).astype(o_ref.dtype)


def ln_linear(x, g, bln, w, b, activation="none", out_dtype=jnp.float32,
              *, tm_target=256, tn_target=512):
    M, K = x.shape
    N = w.shape[1]
    tm = _pick_tile(M, tm_target, 16)
    tn = _pick_tile(N, tn_target, 128)
    return pl.pallas_call(
        functools.partial(_ln_matmul_kernel, activation=activation),
        out_shape=jax.ShapeDtypeStruct((M, N), out_dtype),
        grid=(M // tm, N // tn),
        in_specs=[
            pl.BlockSpec((tm, K), lambda i, j: (i, 0)),
            pl.BlockSpec((1, K), lambda i, j: (0, 0)),
            pl.BlockSpec((1, K), lambda i, j: (0, 0)),
            pl.BlockSpec((K, tn), lambda i, j: (0, j)),
            pl.BlockSpec((1, tn), lambda i, j: (0, j)),
        ],
        out_specs=pl.BlockSpec((tm, tn), lambda i, j: (i, j)),
        scratch_shapes=[pltpu.VMEM((tm, K), jnp.bfloat16)],   # cached LN(x) in bf16
        compiler_params=pltpu.CompilerParams(
            dimension_semantics=("parallel", "arbitrary"),
            vmem_limit_bytes=_VMEM_LIMIT),
    )(x, g, bln, w, b)


# ---------------------------------------------------------------------------
# fused attention block: LN1 -> per-head QKV -> attention -> out-proj -> +residual
# grid = (batch, head); head axis accumulates the projected output into the
# resident output block (residual + proj bias initialized at h == 0).
# ---------------------------------------------------------------------------
def _attn_block_kernel(x_ref, g_ref, bln_ref, wq_ref, wk_ref, wv_ref,
                       bq_ref, bk_ref, bv_ref, wp_ref, bp_ref,
                       o_ref, xn_ref, *, scale):
    h = pl.program_id(1)

    @pl.when(h == 0)
    def _():
        x = x_ref[0]                                     # (N, D) f32 residual stream
        mu = jnp.mean(x, axis=-1, keepdims=True)
        xc = x - mu
        var = jnp.mean(xc * xc, axis=-1, keepdims=True)
        xn_ref[...] = (xc * jax.lax.rsqrt(var + 1e-5) * g_ref[...]
                       + bln_ref[...]).astype(jnp.bfloat16)
        o_ref[0] = x + bp_ref[...]                       # init: residual + proj bias

    xn = xn_ref[...]                                     # (N, D) bf16, cached across heads
    q = (jnp.dot(xn, wq_ref[0], preferred_element_type=jnp.float32) + bq_ref[0]) * scale
    k = jnp.dot(xn, wk_ref[0], preferred_element_type=jnp.float32) + bk_ref[0]
    v = jnp.dot(xn, wv_ref[0], preferred_element_type=jnp.float32) + bv_ref[0]

    s = jax.lax.dot_general(q.astype(jnp.bfloat16), k.astype(jnp.bfloat16),
                            (((1,), (1,)), ((), ())),
                            preferred_element_type=jnp.float32)       # (N, N)
    m = jnp.max(s, axis=-1, keepdims=True)
    p = jnp.exp(s - m)
    l = jnp.sum(p, axis=-1, keepdims=True)
    o = jnp.dot(p.astype(jnp.bfloat16), v.astype(jnp.bfloat16),
                preferred_element_type=jnp.float32)
    o = o * pl.reciprocal(l, approx=True)

    # accumulate this head's contribution through its slice of the output projection
    o_ref[0] += jnp.dot(o.astype(jnp.bfloat16), wp_ref[0],
                        preferred_element_type=jnp.float32)


def attention_block(x, p, num_heads):
    B, N, D = x.shape
    Dh = D // num_heads
    scale = 1.0 / math.sqrt(Dh)
    return pl.pallas_call(
        functools.partial(_attn_block_kernel, scale=scale),
        out_shape=jax.ShapeDtypeStruct((B, N, D), jnp.float32),
        grid=(B, num_heads),
        in_specs=[
            pl.BlockSpec((1, N, D), lambda b, h: (b, 0, 0)),    # x (residual + LN input)
            pl.BlockSpec((1, D), lambda b, h: (0, 0)),          # ln1 gamma
            pl.BlockSpec((1, D), lambda b, h: (0, 0)),          # ln1 beta
            pl.BlockSpec((1, D, Dh), lambda b, h: (h, 0, 0)),   # wq head slab
            pl.BlockSpec((1, D, Dh), lambda b, h: (h, 0, 0)),   # wk head slab
            pl.BlockSpec((1, D, Dh), lambda b, h: (h, 0, 0)),   # wv head slab
            pl.BlockSpec((1, 1, Dh), lambda b, h: (h, 0, 0)),   # bq
            pl.BlockSpec((1, 1, Dh), lambda b, h: (h, 0, 0)),   # bk
            pl.BlockSpec((1, 1, Dh), lambda b, h: (h, 0, 0)),   # bv
            pl.BlockSpec((1, Dh, D), lambda b, h: (h, 0, 0)),   # proj rows for head h
            pl.BlockSpec((1, D), lambda b, h: (0, 0)),          # proj bias
        ],
        out_specs=pl.BlockSpec((1, N, D), lambda b, h: (b, 0, 0)),
        scratch_shapes=[pltpu.VMEM((N, D), jnp.bfloat16)],      # cached LN1(x)
        compiler_params=pltpu.CompilerParams(
            dimension_semantics=("parallel", "arbitrary"),
            vmem_limit_bytes=_VMEM_LIMIT),
    )(x, p["ln1_g"], p["ln1_b"], p["wq"], p["wk"], p["wv"],
      p["bq"], p["bk"], p["bv"], p["wp"], p["proj_b"])


# ---------------------------------------------------------------------------
# patch embed: tokens @ W + b + pos_enc  (pos add fused, no broadcast materialized)
# ---------------------------------------------------------------------------
def _patch_embed_kernel(x_ref, w_ref, b_ref, pos_ref, o_ref):
    o_ref[0] = (jnp.dot(x_ref[0].astype(jnp.bfloat16), w_ref[...],
                        preferred_element_type=jnp.float32)
                + b_ref[...] + pos_ref[...])


def patch_embed(tok, w, b, pos):
    B, N, Cpp = tok.shape
    D = w.shape[1]
    return pl.pallas_call(
        _patch_embed_kernel,
        out_shape=jax.ShapeDtypeStruct((B, N, D), jnp.float32),
        grid=(B,),
        in_specs=[
            pl.BlockSpec((1, N, Cpp), lambda b: (b, 0, 0)),
            pl.BlockSpec((Cpp, D), lambda b: (0, 0)),
            pl.BlockSpec((1, D), lambda b: (0, 0)),
            pl.BlockSpec((N, D), lambda b: (0, 0)),
        ],
        out_specs=pl.BlockSpec((1, N, D), lambda b: (b, 0, 0)),
        compiler_params=pltpu.CompilerParams(
            dimension_semantics=("parallel",), vmem_limit_bytes=_VMEM_LIMIT),
    )(tok, w, b, pos)


# ---------------------------------------------------------------------------
# fused: encoder-final LN -> FSQ project_in -> round -> project_out (+ pos_dec add)
# ---------------------------------------------------------------------------
def _fsq_kernel(x_ref, g_ref, bln_ref, wi_ref, bi_ref, tab_ref, wo_ref, bo_ref,
                pos_ref, zq_ref, idx_ref):
    x = x_ref[0]                                         # (N, D)
    mu = jnp.mean(x, axis=-1, keepdims=True)
    xc = x - mu
    var = jnp.mean(xc * xc, axis=-1, keepdims=True)
    h = xc * jax.lax.rsqrt(var + 1e-5) * g_ref[...] + bln_ref[...]

    # project_in kept f32 so code selection near quantization boundaries matches reference
    z = jnp.dot(h, wi_ref[...], preferred_element_type=jnp.float32) + bi_ref[...]

    half_l = tab_ref[0:1, :]
    offset = tab_ref[1:2, :]
    shift = tab_ref[2:3, :]
    half_w = tab_ref[3:4, :]
    basis = tab_ref[4:5, :]

    bounded = jnp.tanh(z + shift) * half_l - offset
    q = jnp.floor(bounded + 0.5)          # round-to-nearest (ties measure-zero after tanh)
    codes = q + half_w                    # integer codes in [0, level)
    idx = jnp.sum(codes * basis, axis=-1, keepdims=True)
    idx_ref[0] = idx.astype(jnp.int32)    # codebook (1000) far below f32 exactness limit

    zq_n = q / half_w                     # (N, d), d = len(levels)
    # project_out on the VPU: d is tiny, a d-deep MXU matmul is ~3% utilized.
    out = bo_ref[...] + pos_ref[...]      # decoder positional add fused here
    for j in range(zq_n.shape[-1]):       # static, tiny loop
        out = out + zq_n[:, j:j + 1] * wo_ref[j:j + 1, :]
    zq_ref[0] = out


def fsq_fused(x, g, bln, wi, bi, table, wo, bo, pos_dec):
    B, N, D = x.shape
    d = wi.shape[1]
    return pl.pallas_call(
        _fsq_kernel,
        out_shape=(
            jax.ShapeDtypeStruct((B, N, D), jnp.float32),
            jax.ShapeDtypeStruct((B, N, 1), jnp.int32),    # tiny; masked store acceptable
        ),
        grid=(B,),
        in_specs=[
            pl.BlockSpec((1, N, D), lambda b: (b, 0, 0)),
            pl.BlockSpec((1, D), lambda b: (0, 0)),
            pl.BlockSpec((1, D), lambda b: (0, 0)),
            pl.BlockSpec((D, d), lambda b: (0, 0)),
            pl.BlockSpec((1, d), lambda b: (0, 0)),
            pl.BlockSpec((5, d), lambda b: (0, 0)),
            pl.BlockSpec((d, D), lambda b: (0, 0)),
            pl.BlockSpec((1, D), lambda b: (0, 0)),
            pl.BlockSpec((N, D), lambda b: (0, 0)),
        ],
        out_specs=(
            pl.BlockSpec((1, N, D), lambda b: (b, 0, 0)),
            pl.BlockSpec((1, N, 1), lambda b: (b, 0, 0)),
        ),
        compiler_params=pltpu.CompilerParams(
            dimension_semantics=("parallel",), vmem_limit_bytes=_VMEM_LIMIT),
    )(x, g, bln, wi, bi, table, wo, bo, pos_dec)


# ---------------------------------------------------------------------------
# model glue (reshapes / parameter bookkeeping in plain JAX)
# ---------------------------------------------------------------------------
def patchify(x, P):
    # NCHW -> (B, N, C*P*P), matching Conv2d(kernel=P, stride=P) weight flattening (c, p, q)
    B, C, H, W = x.shape
    Hp, Wp = H // P, W // P
    x = x.reshape(B, C, Hp, P, Wp, P)
    x = x.transpose(0, 2, 4, 1, 3, 5)
    return x.reshape(B, Hp * Wp, C * P * P)


def unpatchify(x, P, C, H, W):
    B, N, _ = x.shape
    Hp, Wp = H // P, W // P
    x = x.reshape(B, Hp, Wp, C, P, P)
    x = x.transpose(0, 3, 1, 4, 2, 5)
    return x.reshape(B, C, H, W)


def transformer_block(x, p, num_heads):
    B, N, D = x.shape
    # fused: LN1 -> QKV -> per-head attention -> out-proj -> +residual  (one kernel)
    x = attention_block(x, p, num_heads)
    xf = x.reshape(B * N, D)
    # LN2 + fc1 + GELU, bf16 output (feeds only the fc2 matmul -> halves HBM traffic)
    h = ln_linear(xf, p["ln2_g"], p["ln2_b"], p["fc1_w"], p["fc1_b"],
                  activation="gelu", out_dtype=jnp.bfloat16)
    xf = linear(h, p["fc2_w"], p["fc2_b"], add=xf)          # fc2 + residual fused, f32 out
    return xf.reshape(B, N, D)


def encode(params, x, P, num_heads):
    tok = patchify(x, P)
    t = patch_embed(tok, params["patch_w"], params["patch_b"], params["pos_enc"])
    for blk, h in zip(params["enc_blocks"], num_heads):
        t = transformer_block(t, blk, h)
    return t   # final encoder LayerNorm is fused into the FSQ kernel


def quantize(params, z):
    # returns (z_q + pos_dec, indices); the pos_dec add (first decoder op) is fused into
    # the FSQ project_out epilogue — z_q is only consumed by the decoder in forward().
    B, N, D = z.shape
    zq_pos, idx = fsq_fused(
        z, params["enc_ln_g"], params["enc_ln_b"],
        params["fsq_in_w"], params["fsq_in_b"], params["fsq_table"],
        params["fsq_out_w"], params["fsq_out_b"], params["pos_dec"])
    return zq_pos, idx.reshape(B, N)


def decode(params, t, P, C, H, W, num_heads):
    B, N, D = t.shape
    for blk, h in zip(params["dec_blocks"], num_heads):
        t = transformer_block(t, blk, h)
    # decoder-final LN fused with the image head + clamp(-1, 1)
    pix = ln_linear(t.reshape(B * N, D), params["dec_ln_g"], params["dec_ln_b"],
                    params["head_w"], params["head_b"], activation="clamp")
    return unpatchify(pix.reshape(B, N, -1), P, C, H, W)


def forward(params, x, *, patch_size, num_heads):
    B, C, H, W = x.shape
    x_enc = encode(params, x, patch_size, num_heads)
    z_q_pos, indices = quantize(params, x_enc)
    recon = decode(params, z_q_pos, patch_size, C, H, W, num_heads)
    loss = jnp.array(0)                                    # torch.tensor(data=0)
    return recon, indices, loss


# ---------------------------------------------------------------------------
# deterministic parameter init (synthetic — no checkpoint load)
# ---------------------------------------------------------------------------
def _init_linear(key, fan_in, fan_out, w_dtype=jnp.bfloat16):
    w = (0.02 * jax.random.normal(key, (fan_in, fan_out), jnp.float32)).astype(w_dtype)
    b = jnp.zeros((1, fan_out), jnp.float32)
    return w, b


def _init_block(key, dim, heads):
    ks = jax.random.split(key, 4)
    Dh = dim // heads
    wqkv = 0.02 * jax.random.normal(ks[0], (dim, 3 * dim), jnp.float32)
    wq, wk, wv = jnp.split(wqkv, 3, axis=1)

    def head_cols(w):                      # (D, D) -> (nh, D, Dh) bf16
        return jnp.transpose(w.reshape(dim, heads, Dh), (1, 0, 2)).astype(jnp.bfloat16)

    wp = 0.02 * jax.random.normal(ks[1], (dim, dim), jnp.float32)
    p = {
        "ln1_g": jnp.ones((1, dim), jnp.float32),
        "ln1_b": jnp.zeros((1, dim), jnp.float32),
        "ln2_g": jnp.ones((1, dim), jnp.float32),
        "ln2_b": jnp.zeros((1, dim), jnp.float32),
        "wq": head_cols(wq), "wk": head_cols(wk), "wv": head_cols(wv),
        "bq": jnp.zeros((heads, 1, Dh), jnp.float32),
        "bk": jnp.zeros((heads, 1, Dh), jnp.float32),
        "bv": jnp.zeros((heads, 1, Dh), jnp.float32),
        "wp": wp.reshape(heads, Dh, dim).astype(jnp.bfloat16),   # proj rows grouped by head
        "proj_b": jnp.zeros((1, dim), jnp.float32),
    }
    p["fc1_w"], p["fc1_b"] = _init_linear(ks[2], dim, 4 * dim)
    p["fc2_w"], p["fc2_b"] = _init_linear(ks[3], 4 * dim, dim)
    return p


def init_model(key, *, input_res, patch_size, num_channels, dim, num_heads, levels):
    H, W = input_res
    P = patch_size
    N = (H // P) * (W // P)
    patch_dim = num_channels * P * P
    d = len(levels)
    ks = iter(jax.random.split(key, 32))
    params = {}
    params["patch_w"], params["patch_b"] = _init_linear(next(ks), patch_dim, dim)
    params["pos_enc"] = 0.02 * jax.random.normal(next(ks), (N, dim), jnp.float32)
    params["enc_blocks"] = [_init_block(next(ks), dim, h) for h in num_heads]
    params["enc_ln_g"] = jnp.ones((1, dim), jnp.float32)
    params["enc_ln_b"] = jnp.zeros((1, dim), jnp.float32)

    # FSQ projections (kept f32: tiny, precision-sensitive) + per-level constants
    params["fsq_in_w"], params["fsq_in_b"] = _init_linear(next(ks), dim, d, jnp.float32)
    params["fsq_out_w"], params["fsq_out_b"] = _init_linear(next(ks), d, dim, jnp.float32)
    lv = jnp.asarray(levels, jnp.float32)
    eps = 1e-3
    half_l = (lv - 1.0) * (1.0 + eps) / 2.0
    offset = jnp.where(jnp.asarray(levels) % 2 == 0, 0.5, 0.0).astype(jnp.float32)
    shift = jnp.arctanh(offset / half_l)
    half_w = jnp.asarray([l // 2 for l in levels], jnp.float32)
    basis = jnp.concatenate([jnp.ones((1,), jnp.float32), jnp.cumprod(lv[:-1])])
    params["fsq_table"] = jnp.stack([half_l, offset, shift, half_w, basis], axis=0)

    params["pos_dec"] = 0.02 * jax.random.normal(next(ks), (N, dim), jnp.float32)
    params["dec_blocks"] = [_init_block(next(ks), dim, h) for h in num_heads]
    params["dec_ln_g"] = jnp.ones((1, dim), jnp.float32)
    params["dec_ln_b"] = jnp.zeros((1, dim), jnp.float32)
    params["head_w"], params["head_b"] = _init_linear(next(ks), dim, patch_dim)
    return params


# ---------------------------------------------------------------------------
if __name__ == "__main__":
    B, C, H, W = 2, 3, 16, 16
    patch_size = 4
    dim = 32
    num_heads = (2, 2)                 # one transformer block per entry
    levels = [8, 5, 5, 5]              # FSQ codebook levels

    key = jax.random.PRNGKey(0)
    k_params, k_x = jax.random.split(key)
    params = init_model(
        k_params,
        input_res=(H, W),
        patch_size=patch_size,
        num_channels=C,
        dim=dim,
        num_heads=num_heads,
        levels=levels,
    )
    x = jax.random.normal(k_x, (B, C, H, W), jnp.float32)

    fwd = jax.jit(functools.partial(forward, patch_size=patch_size, num_heads=num_heads))
    recon, indices, loss = fwd(params, x)
    jax.block_until_ready((recon, indices, loss))

    N = (H // patch_size) * (W // patch_size)
    assert recon.shape == (B, C, H, W)
    assert indices.shape == (B, N)
    assert indices.dtype == jnp.int32
    assert float(jnp.max(jnp.abs(recon))) <= 1.0 + 1e-6
    assert int(jnp.min(indices)) >= 0 and int(jnp.max(indices)) < 8 * 5 * 5 * 5
    print("KERNEL_OK")
</pallas_src>

<mosaic_0001>
module attributes {stable_mosaic.version = 11 : i64} {
  func.func @_patch_embed_kernel(%arg0: i32, %arg1: memref<1x16x48xf32, #tpu.memory_space<vmem>>, %arg2: memref<48x32xbf16, #tpu.memory_space<vmem>>, %arg3: memref<1x32xf32, #tpu.memory_space<vmem>>, %arg4: memref<16x32xf32, #tpu.memory_space<vmem>>, %arg5: memref<1x16x32xf32, #tpu.memory_space<vmem>>) attributes {dimension_semantics = [#tpu.dimension_semantics<parallel>], iteration_bounds = array<i64: 2>, scalar_prefetch = 0 : i64, scratch_operands = 0 : i64, tpu.core_type = #tpu.core_type<tc>, window_params = [{transform_indices = @transform_0, window_bounds = array<i64: 1, 16, 48>}, {pipeline_mode = #tpu.pipeline_mode<synchronous>, transform_indices = @transform_1, window_bounds = array<i64: 48, 32>}, {pipeline_mode = #tpu.pipeline_mode<synchronous>, transform_indices = @transform_2, window_bounds = array<i64: 1, 32>}, {pipeline_mode = #tpu.pipeline_mode<synchronous>, transform_indices = @transform_3, window_bounds = array<i64: 16, 32>}, {transform_indices = @transform_4, window_bounds = array<i64: 1, 16, 32>}]} {
    %c0 = arith.constant 0 : index
    %c0_0 = arith.constant 0 : index
    %c0_1 = arith.constant 0 : index
    %0 = vector.load %arg1[%c0, %c0_0, %c0_1] : memref<1x16x48xf32, #tpu.memory_space<vmem>>, vector<1x16x48xf32>
    %1 = vector.shape_cast %0 : vector<1x16x48xf32> to vector<16x48xf32>
    %2 = arith.truncf %1 : vector<16x48xf32> to vector<16x48xbf16>
    %c0_2 = arith.constant 0 : index
    %c0_3 = arith.constant 0 : index
    %3 = vector.load %arg2[%c0_2, %c0_3] : memref<48x32xbf16, #tpu.memory_space<vmem>>, vector<48x32xbf16>
    %cst = arith.constant dense<0.000000e+00> : vector<16x32xf32>
    %4 = tpu.matmul %2, %3, %cst {dimension_numbers = #tpu.dot_dimension_numbers<[1], [0], [0], [1], [0, 0, 1, 1], [], []>} : vector<16x48xbf16>, vector<48x32xbf16>, vector<16x32xf32> -> vector<16x32xf32>
    %c0_4 = arith.constant 0 : index
    %c0_5 = arith.constant 0 : index
    %5 = vector.load %arg3[%c0_4, %c0_5] : memref<1x32xf32, #tpu.memory_space<vmem>>, vector<1x32xf32>
    %6 = vector.broadcast %5 : vector<1x32xf32> to vector<16x32xf32>
    %7 = arith.addf %4, %6 : vector<16x32xf32>
    %c0_6 = arith.constant 0 : index
    %c0_7 = arith.constant 0 : index
    %8 = vector.load %arg4[%c0_6, %c0_7] : memref<16x32xf32, #tpu.memory_space<vmem>>, vector<16x32xf32>
    %9 = arith.addf %7, %8 : vector<16x32xf32>
    %c0_8 = arith.constant 0 : index
    %c0_9 = arith.constant 0 : index
    %c0_10 = arith.constant 0 : index
    %10 = vector.load %arg5[%c0_8, %c0_9, %c0_10] : memref<1x16x32xf32, #tpu.memory_space<vmem>>, vector<1x16x32xf32>
    %11 = vector.shape_cast %10 : vector<1x16x32xf32> to vector<16x32xf32>
    %12 = vector.shape_cast %9 : vector<16x32xf32> to vector<1x16x32xf32>
    tpu.vector_store %arg5[%c0_8, %c0_9, %c0_10], %12 {strides = array<i32>} : memref<1x16x32xf32, #tpu.memory_space<vmem>>, vector<1x16x32xf32>,
    return
  }
  func.func @transform_0(%arg0: i32) -> (i32, i32, i32) {
    %c0_i32 = arith.constant 0 : i32
    %c0_i32_0 = arith.constant 0 : i32
    %c0_i32_1 = arith.constant 0 : i32
    return %arg0, %c0_i32, %c0_i32_0 : i32, i32, i32
  }
  func.func @transform_1(%arg0: i32) -> (i32, i32) {
    %c0_i32 = arith.constant 0 : i32
    %c0_i32_0 = arith.constant 0 : i32
    %c0_i32_1 = arith.constant 0 : i32
    return %c0_i32, %c0_i32_0 : i32, i32
  }
  func.func @transform_2(%arg0: i32) -> (i32, i32) {
    %c0_i32 = arith.constant 0 : i32
    %c0_i32_0 = arith.constant 0 : i32
    %c0_i32_1 = arith.constant 0 : i32
    return %c0_i32, %c0_i32_0 : i32, i32
  }
  func.func @transform_3(%arg0: i32) -> (i32, i32) {
    %c0_i32 = arith.constant 0 : i32
    %c0_i32_0 = arith.constant 0 : i32
    %c0_i32_1 = arith.constant 0 : i32
    return %c0_i32, %c0_i32_0 : i32, i32
  }
  func.func @transform_4(%arg0: i32) -> (i32, i32, i32) {
    %c0_i32 = arith.constant 0 : i32
    %c0_i32_0 = arith.constant 0 : i32
    %c0_i32_1 = arith.constant 0 : i32
    return %arg0, %c0_i32, %c0_i32_0 : i32, i32, i32
  }
}

module attributes {stable_mosaic.version = 11 : i64} {
  func.func @_attn_block_kernel(%arg0: i32, %arg1: i32, %arg2: memref<1x16x32xf32, #tpu.memory_space<vmem>>, %arg3: memref<1x32xf32, #tpu.memory_space<vmem>>, %arg4: memref<1x32xf32, #tpu.memory_space<vmem>>, %arg5: memref<1x32x16xbf16, #tpu.memory_space<vmem>>, %arg6: memref<1x32x16xbf16, #tpu.memory_space<vmem>>, %arg7: memref<1x32x16xbf16, #tpu.memory_space<vmem>>, %arg8: memref<1x1x16xf32, #tpu.memory_space<vmem>>, %arg9: memref<1x1x16xf32, #tpu.memory_space<vmem>>, %arg10: memref<1x1x16xf32, #tpu.memory_space<vmem>>, %arg11: memref<1x16x32xbf16, #tpu.memory_space<vmem>>, %arg12: memref<1x32xf32, #tpu.memory_space<vmem>>, %arg13: memref<1x16x32xf32, #tpu.memory_space<vmem>>, %arg14: memref<16x32xbf16, #tpu.memory_space<vmem>>) attributes {dimension_semantics = [#tpu.dimension_semantics<parallel>, #tpu.dimension_semantics<arbitrary>], iteration_bounds = array<i64: 2, 2>, scalar_prefetch = 0 : i64, scratch_operands = 1 : i64, tpu.core_type = #tpu.core_type<tc>, window_params = [{transform_indices = @transform_0, window_bounds = array<i64: 1, 16, 32>}, {pipeline_mode = #tpu.pipeline_mode<synchronous>, transform_indices = @transform_1, window_bounds = array<i64: 1, 32>}, {pipeline_mode = #tpu.pipeline_mode<synchronous>, transform_indices = @transform_2, window_bounds = array<i64: 1, 32>}, {transform_indices = @transform_3, window_bounds = array<i64: 1, 32, 16>}, {transform_indices = @transform_4, window_bounds = array<i64: 1, 32, 16>}, {transform_indices = @transform_5, window_bounds = array<i64: 1, 32, 16>}, {transform_indices = @transform_6, window_bounds = array<i64: 1, 1, 16>}, {transform_indices = @transform_7, window_bounds = array<i64: 1, 1, 16>}, {transform_indices = @transform_8, window_bounds = array<i64: 1, 1, 16>}, {transform_indices = @transform_9, window_bounds = array<i64: 1, 16, 32>}, {pipeline_mode = #tpu.pipeline_mode<synchronous>, transform_indices = @transform_10, window_bounds = array<i64: 1, 32>}, {transform_indices = @transform_11, window_bounds = array<i64: 1, 16, 32>}]} {
    %c0_i32 = arith.constant 0 : i32
    %0 = arith.cmpi eq, %arg1, %c0_i32 : i32
    %1 = arith.extui %0 : i1 to i32
    %c0_i32_0 = arith.constant 0 : i32
    %2 = arith.cmpi ne, %1, %c0_i32_0 : i32
    scf.if %2 {
      %c0_37 = arith.constant 0 : index
      %c0_38 = arith.constant 0 : index
      %c0_39 = arith.constant 0 : index
      %53 = vector.load %arg2[%c0_37, %c0_38, %c0_39] : memref<1x16x32xf32, #tpu.memory_space<vmem>>, vector<1x16x32xf32>
      %54 = vector.shape_cast %53 : vector<1x16x32xf32> to vector<16x32xf32>
      %cst_40 = arith.constant dense<0.000000e+00> : vector<16xf32>
      %55 = vector.multi_reduction <add>, %54, %cst_40 [1] : vector<16x32xf32> to vector<16xf32>
      %56 = vector.shape_cast %55 : vector<16xf32> to vector<16x1xf32>
      %cst_41 = arith.constant 3.200000e+01 : f32
      %57 = vector.broadcast %cst_41 : f32 to vector<16x1xf32>
      %58 = arith.divf %56, %57 : vector<16x1xf32>
      %59 = vector.broadcast %58 : vector<16x1xf32> to vector<16x32xf32>
      %60 = arith.subf %54, %59 : vector<16x32xf32>
      %61 = arith.mulf %60, %60 : vector<16x32xf32>
      %cst_42 = arith.constant dense<0.000000e+00> : vector<16xf32>
      %62 = vector.multi_reduction <add>, %61, %cst_42 [1] : vector<16x32xf32> to vector<16xf32>
      %63 = vector.shape_cast %62 : vector<16xf32> to vector<16x1xf32>
      %cst_43 = arith.constant 3.200000e+01 : f32
      %64 = vector.broadcast %cst_43 : f32 to vector<16x1xf32>
      %65 = arith.divf %63, %64 : vector<16x1xf32>
      %cst_44 = arith.constant 9.99999974E-6 : f32
      %66 = vector.broadcast %cst_44 : f32 to vector<16x1xf32>
      %67 = arith.addf %65, %66 : vector<16x1xf32>
      %68 = math.rsqrt %67 : vector<16x1xf32>
      %69 = vector.broadcast %68 : vector<16x1xf32> to vector<16x32xf32>
      %70 = arith.mulf %60, %69 : vector<16x32xf32>
      %c0_45 = arith.constant 0 : index
      %c0_46 = arith.constant 0 : index
      %71 = vector.load %arg3[%c0_45, %c0_46] : memref<1x32xf32, #tpu.memory_space<vmem>>, vector<1x32xf32>
      %72 = vector.broadcast %71 : vector<1x32xf32> to vector<16x32xf32>
      %73 = arith.mulf %70, %72 : vector<16x32xf32>
      %c0_47 = arith.constant 0 : index
      %c0_48 = arith.constant 0 : index
      %74 = vector.load %arg4[%c0_47, %c0_48] : memref<1x32xf32, #tpu.memory_space<vmem>>, vector<1x32xf32>
      %75 = vector.broadcast %74 : vector<1x32xf32> to vector<16x32xf32>
      %76 = arith.addf %73, %75 : vector<16x32xf32>
      %77 = arith.truncf %76 : vector<16x32xf32> to vector<16x32xbf16>
      %c0_49 = arith.constant 0 : index
      %c0_50 = arith.constant 0 : index
      %78 = vector.load %arg14[%c0_49, %c0_50] : memref<16x32xbf16, #tpu.memory_space<vmem>>, vector<16x32xbf16>
      tpu.vector_store %arg14[%c0_49, %c0_50], %77 {strides = array<i32>} : memref<16x32xbf16, #tpu.memory_space<vmem>>, vector<16x32xbf16>,
      %c0_51 = arith.constant 0 : index
      %c0_52 = arith.constant 0 : index
      %79 = vector.load %arg12[%c0_51, %c0_52] : memref<1x32xf32, #tpu.memory_space<vmem>>, vector<1x32xf32>
      %80 = vector.broadcast %79 : vector<1x32xf32> to vector<16x32xf32>
      %81 = arith.addf %54, %80 : vector<16x32xf32>
      %c0_53 = arith.constant 0 : index
      %c0_54 = arith.constant 0 : index
      %c0_55 = arith.constant 0 : index
      %82 = vector.load %arg13[%c0_53, %c0_54, %c0_55] : memref<1x16x32xf32, #tpu.memory_space<vmem>>, vector<1x16x32xf32>
      %83 = vector.shape_cast %82 : vector<1x16x32xf32> to vector<16x32xf32>
      %84 = vector.shape_cast %81 : vector<16x32xf32> to vector<1x16x32xf32>
      tpu.vector_store %arg13[%c0_53, %c0_54, %c0_55], %84 {strides = array<i32>} : memref<1x16x32xf32, #tpu.memory_space<vmem>>, vector<1x16x32xf32>,
    } else {
    }
    %c0 = arith.constant 0 : index
    %c0_1 = arith.constant 0 : index
    %3 = vector.load %arg14[%c0, %c0_1] : memref<16x32xbf16, #tpu.memory_space<vmem>>, vector<16x32xbf16>
    %c0_2 = arith.constant 0 : index
    %c0_3 = arith.constant 0 : index
    %c0_4 = arith.constant 0 : index
    %4 = vector.load %arg5[%c0_2, %c0_3, %c0_4] : memref<1x32x16xbf16, #tpu.memory_space<vmem>>, vector<1x32x16xbf16>
    %5 = vector.shape_cast %4 : vector<1x32x16xbf16> to vector<32x16xbf16>
    %cst = arith.constant dense<0.000000e+00> : vector<16x16xf32>
    %6 = tpu.matmul %3, %5, %cst {dimension_numbers = #tpu.dot_dimension_numbers<[1], [0], [0], [1], [0, 0, 1, 1], [], []>} : vector<16x32xbf16>, vector<32x16xbf16>, vector<16x16xf32> -> vector<16x16xf32>
    %c0_5 = arith.constant 0 : index
    %c0_6 = arith.constant 0 : index
    %c0_7 = arith.constant 0 : index
    %7 = vector.load %arg8[%c0_5, %c0_6, %c0_7] : memref<1x1x16xf32, #tpu.memory_space<vmem>>, vector<1x1x16xf32>
    %8 = vector.shape_cast %7 : vector<1x1x16xf32> to vector<1x16xf32>
    %9 = vector.broadcast %8 : vector<1x16xf32> to vector<16x16xf32>
    %10 = arith.addf %6, %9 : vector<16x16xf32>
    %cst_8 = arith.constant 2.500000e-01 : f32
    %11 = vector.broadcast %cst_8 : f32 to vector<16x16xf32>
    %12 = arith.mulf %10, %11 : vector<16x16xf32>
    %c0_9 = arith.constant 0 : index
    %c0_10 = arith.constant 0 : index
    %c0_11 = arith.constant 0 : index
    %13 = vector.load %arg6[%c0_9, %c0_10, %c0_11] : memref<1x32x16xbf16, #tpu.memory_space<vmem>>, vector<1x32x16xbf16>
    %14 = vector.shape_cast %13 : vector<1x32x16xbf16> to vector<32x16xbf16>
    %cst_12 = arith.constant dense<0.000000e+00> : vector<16x16xf32>
    %15 = tpu.matmul %3, %14, %cst_12 {dimension_numbers = #tpu.dot_dimension_numbers<[1], [0], [0], [1], [0, 0, 1, 1], [], []>} : vector<16x32xbf16>, vector<32x16xbf16>, vector<16x16xf32> -> vector<16x16xf32>
    %c0_13 = arith.constant 0 : index
    %c0_14 = arith.constant 0 : index
    %c0_15 = arith.constant 0 : index
    %16 = vector.load %arg9[%c0_13, %c0_14, %c0_15] : memref<1x1x16xf32, #tpu.memory_space<vmem>>, vector<1x1x16xf32>
    %17 = vector.shape_cast %16 : vector<1x1x16xf32> to vector<1x16xf32>
    %18 = vector.broadcast %17 : vector<1x16xf32> to vector<16x16xf32>
    %19 = arith.addf %15, %18 : vector<16x16xf32>
    %c0_16 = arith.constant 0 : index
    %c0_17 = arith.constant 0 : index
    %c0_18 = arith.constant 0 : index
    %20 = vector.load %arg7[%c0_16, %c0_17, %c0_18] : memref<1x32x16xbf16, #tpu.memory_space<vmem>>, vector<1x32x16xbf16>
    %21 = vector.shape_cast %20 : vector<1x32x16xbf16> to vector<32x16xbf16>
    %cst_19 = arith.constant dense<0.000000e+00> : vector<16x16xf32>
    %22 = tpu.matmul %3, %21, %cst_19 {dimension_numbers = #tpu.dot_dimension_numbers<[1], [0], [0], [1], [0, 0, 1, 1], [], []>} : vector<16x32xbf16>, vector<32x16xbf16>, vector<16x16xf32> -> vector<16x16xf32>
    %c0_20 = arith.constant 0 : index
    %c0_21 = arith.constant 0 : index
    %c0_22 = arith.constant 0 : index
    %23 = vector.load %arg10[%c0_20, %c0_21, %c0_22] : memref<1x1x16xf32, #tpu.memory_space<vmem>>, vector<1x1x16xf32>
    %24 = vector.shape_cast %23 : vector<1x1x16xf32> to vector<1x16xf32>
    %25 = vector.broadcast %24 : vector<1x16xf32> to vector<16x16xf32>
    %26 = arith.addf %22, %25 : vector<16x16xf32>
    %27 = arith.truncf %12 : vector<16x16xf32> to vector<16x16xbf16>
    %28 = arith.truncf %19 : vector<16x16xf32> to vector<16x16xbf16>
    %cst_23 = arith.constant dense<0.000000e+00> : vector<16x16xf32>
    %29 = tpu.matmul %27, %28, %cst_23 {dimension_numbers = #tpu.dot_dimension_numbers<[1], [1], [0], [0], [0, 0, 1, 0], [], []>} : vector<16x16xbf16>, vector<16x16xbf16>, vector<16x16xf32> -> vector<16x16xf32>
    %cst_24 = arith.constant dense<0xFF800000> : vector<16xf32>
    %30 = vector.multi_reduction <maximumf>, %29, %cst_24 [1] : vector<16x16xf32> to vector<16xf32>
    %31 = vector.shape_cast %30 : vector<16xf32> to vector<16x1xf32>
    %32 = vector.broadcast %31 : vector<16x1xf32> to vector<16x16xf32>
    %33 = arith.subf %29, %32 : vector<16x16xf32>
    %34 = math.exp %33 : vector<16x16xf32>
    %cst_25 = arith.constant dense<0.000000e+00> : vector<16xf32>
    %35 = vector.multi_reduction <add>, %34, %cst_25 [1] : vector<16x16xf32> to vector<16xf32>
    %36 = vector.shape_cast %35 : vector<16xf32> to vector<16x1xf32>
    %37 = arith.truncf %34 : vector<16x16xf32> to vector<16x16xbf16>
    %38 = arith.truncf %26 : vector<16x16xf32> to vector<16x16xbf16>
    %cst_26 = arith.constant dense<0.000000e+00> : vector<16x16xf32>
    %39 = tpu.matmul %37, %38, %cst_26 {dimension_numbers = #tpu.dot_dimension_numbers<[1], [0], [0], [1], [0, 0, 1, 1], [], []>} : vector<16x16xbf16>, vector<16x16xbf16>, vector<16x16xf32> -> vector<16x16xf32>
    %40 = tpu.reciprocal %36 {approx = true} : vector<16x1xf32> -> vector<16x1xf32>
    %41 = vector.broadcast %40 : vector<16x1xf32> to vector<16x16xf32>
    %42 = arith.mulf %39, %41 : vector<16x16xf32>
    %c0_27 = arith.constant 0 : index
    %c0_28 = arith.constant 0 : index
    %c0_29 = arith.constant 0 : index
    %43 = vector.load %arg13[%c0_27, %c0_28, %c0_29] : memref<1x16x32xf32, #tpu.memory_space<vmem>>, vector<1x16x32xf32>
    %44 = vector.shape_cast %43 : vector<1x16x32xf32> to vector<16x32xf32>
    %45 = arith.truncf %42 : vector<16x16xf32> to vector<16x16xbf16>
    %c0_30 = arith.constant 0 : index
    %c0_31 = arith.constant 0 : index
    %c0_32 = arith.constant 0 : index
    %46 = vector.load %arg11[%c0_30, %c0_31, %c0_32] : memref<1x16x32xbf16, #tpu.memory_space<vmem>>, vector<1x16x32xbf16>
    %47 = vector.shape_cast %46 : vector<1x16x32xbf16> to vector<16x32xbf16>
    %cst_33 = arith.constant dense<0.000000e+00> : vector<16x32xf32>
    %48 = tpu.matmul %45, %47, %cst_33 {dimension_numbers = #tpu.dot_dimension_numbers<[1], [0], [0], [1], [0, 0, 1, 1], [], []>} : vector<16x16xbf16>, vector<16x32xbf16>, vector<16x32xf32> -> vector<16x32xf32>
    %49 = arith.addf %44, %48 : vector<16x32xf32>
    %c0_34 = arith.constant 0 : index
    %c0_35 = arith.constant 0 : index
    %c0_36 = arith.constant 0 : index
    %50 = vector.load %arg13[%c0_34, %c0_35, %c0_36] : memref<1x16x32xf32, #tpu.memory_space<vmem>>, vector<1x16x32xf32>
    %51 = vector.shape_cast %50 : vector<1x16x32xf32> to vector<16x32xf32>
    %52 = vector.shape_cast %49 : vector<16x32xf32> to vector<1x16x32xf32>
    tpu.vector_store %arg13[%c0_34, %c0_35, %c0_36], %52 {strides = array<i32>} : memref<1x16x32xf32, #tpu.memory_space<vmem>>, vector<1x16x32xf32>,
    return
  }
  func.func @transform_0(%arg0: i32, %arg1: i32) -> (i32, i32, i32) {
    %c0_i32 = arith.constant 0 : i32
    %c0_i32_0 = arith.constant 0 : i32
    %c0_i32_1 = arith.constant 0 : i32
    return %arg0, %c0_i32, %c0_i32_0 : i32, i32, i32
  }
  func.func @transform_1(%arg0: i32, %arg1: i32) -> (i32, i32) {
    %c0_i32 = arith.constant 0 : i32
    %c0_i32_0 = arith.constant 0 : i32
    %c0_i32_1 = arith.constant 0 : i32
    return %c0_i32, %c0_i32_0 : i32, i32
  }
  func.func @transform_2(%arg0: i32, %arg1: i32) -> (i32, i32) {
    %c0_i32 = arith.constant 0 : i32
    %c0_i32_0 = arith.constant 0 : i32
    %c0_i32_1 = arith.constant 0 : i32
    return %c0_i32, %c0_i32_0 : i32, i32
  }
  func.func @transform_3(%arg0: i32, %arg1: i32) -> (i32, i32, i32) {
    %c0_i32 = arith.constant 0 : i32
    %c0_i32_0 = arith.constant 0 : i32
    %c0_i32_1 = arith.constant 0 : i32
    return %arg1, %c0_i32, %c0_i32_0 : i32, i32, i32
  }
  func.func @transform_4(%arg0: i32, %arg1: i32) -> (i32, i32, i32) {
    %c0_i32 = arith.constant 0 : i32
    %c0_i32_0 = arith.constant 0 : i32
    %c0_i32_1 = arith.constant 0 : i32
    return %arg1, %c0_i32, %c0_i32_0 : i32, i32, i32
  }
  func.func @transform_5(%arg0: i32, %arg1: i32) -> (i32, i32, i32) {
    %c0_i32 = arith.constant 0 : i32
    %c0_i32_0 = arith.constant 0 : i32
    %c0_i32_1 = arith.constant 0 : i32
    return %arg1, %c0_i32, %c0_i32_0 : i32, i32, i32
  }
  func.func @transform_6(%arg0: i32, %arg1: i32) -> (i32, i32, i32) {
    %c0_i32 = arith.constant 0 : i32
    %c0_i32_0 = arith.constant 0 : i32
    %c0_i32_1 = arith.constant 0 : i32
    return %arg1, %c0_i32, %c0_i32_0 : i32, i32, i32
  }
  func.func @transform_7(%arg0: i32, %arg1: i32) -> (i32, i32, i32) {
    %c0_i32 = arith.constant 0 : i32
    %c0_i32_0 = arith.constant 0 : i32
    %c0_i32_1 = arith.constant 0 : i32
    return %arg1, %c0_i32, %c0_i32_0 : i32, i32, i32
  }
  func.func @transform_8(%arg0: i32, %arg1: i32) -> (i32, i32, i32) {
    %c0_i32 = arith.constant 0 : i32
    %c0_i32_0 = arith.constant 0 : i32
    %c0_i32_1 = arith.constant 0 : i32
    return %arg1, %c0_i32, %c0_i32_0 : i32, i32, i32
  }
  func.func @transform_9(%arg0: i32, %arg1: i32) -> (i32, i32, i32) {
    %c0_i32 = arith.constant 0 : i32
    %c0_i32_0 = arith.constant 0 : i32
    %c0_i32_1 = arith.constant 0 : i32
    return %arg1, %c0_i32, %c0_i32_0 : i32, i32, i32
  }
  func.func @transform_10(%arg0: i32, %arg1: i32) -> (i32, i32) {
    %c0_i32 = arith.constant 0 : i32
    %c0_i32_0 = arith.constant 0 : i32
    %c0_i32_1 = arith.constant 0 : i32
    return %c0_i32, %c0_i32_0 : i32, i32
  }
  func.func @transform_11(%arg0: i32, %arg1: i32) -> (i32, i32, i32) {
    %c0_i32 = arith.constant 0 : i32
    %c0_i32_0 = arith.constant 0 : i32
    %c0_i32_1 = arith.constant 0 : i32
    return %arg0, %c0_i32, %c0_i32_0 : i32, i32, i32
  }
}

module attributes {stable_mosaic.version = 11 : i64} {
  func.func @_ln_matmul_kernel(%arg0: i32, %arg1: i32, %arg2: memref<32x32xf32, #tpu.memory_space<vmem>>, %arg3: memref<1x32xf32, #tpu.memory_space<vmem>>, %arg4: memref<1x32xf32, #tpu.memory_space<vmem>>, %arg5: memref<32x128xbf16, #tpu.memory_space<vmem>>, %arg6: memref<1x128xf32, #tpu.memory_space<vmem>>, %arg7: memref<32x128xbf16, #tpu.memory_space<vmem>>, %arg8: memref<32x32xbf16, #tpu.memory_space<vmem>>) attributes {dimension_semantics = [#tpu.dimension_semantics<parallel>, #tpu.dimension_semantics<arbitrary>], iteration_bounds = array<i64: 1, 1>, scalar_prefetch = 0 : i64, scratch_operands = 1 : i64, tpu.core_type = #tpu.core_type<tc>, window_params = [{transform_indices = @transform_0, window_bounds = array<i64: 32, 32>}, {pipeline_mode = #tpu.pipeline_mode<synchronous>, transform_indices = @transform_1, window_bounds = array<i64: 1, 32>}, {pipeline_mode = #tpu.pipeline_mode<synchronous>, transform_indices = @transform_2, window_bounds = array<i64: 1, 32>}, {transform_indices = @transform_3, window_bounds = array<i64: 32, 128>}, {transform_indices = @transform_4, window_bounds = array<i64: 1, 128>}, {transform_indices = @transform_5, window_bounds = array<i64: 32, 128>}]} {
    %c0_i32 = arith.constant 0 : i32
    %0 = arith.cmpi eq, %arg1, %c0_i32 : i32
    %1 = arith.extui %0 : i1 to i32
    %c0_i32_0 = arith.constant 0 : i32
    %2 = arith.cmpi ne, %1, %c0_i32_0 : i32
    scf.if %2 {
      %c0_12 = arith.constant 0 : index
      %c0_13 = arith.constant 0 : index
      %24 = vector.load %arg2[%c0_12, %c0_13] : memref<32x32xf32, #tpu.memory_space<vmem>>, vector<32x32xf32>
      %cst_14 = arith.constant dense<0.000000e+00> : vector<32xf32>
      %25 = vector.multi_reduction <add>, %24, %cst_14 [1] : vector<32x32xf32> to vector<32xf32>
      %26 = vector.shape_cast %25 : vector<32xf32> to vector<32x1xf32>
      %cst_15 = arith.constant 3.200000e+01 : f32
      %27 = vector.broadcast %cst_15 : f32 to vector<32x1xf32>
      %28 = arith.divf %26, %27 : vector<32x1xf32>
      %29 = vector.broadcast %28 : vector<32x1xf32> to vector<32x32xf32>
      %30 = arith.subf %24, %29 : vector<32x32xf32>
      %31 = arith.mulf %30, %30 : vector<32x32xf32>
      %cst_16 = arith.constant dense<0.000000e+00> : vector<32xf32>
      %32 = vector.multi_reduction <add>, %31, %cst_16 [1] : vector<32x32xf32> to vector<32xf32>
      %33 = vector.shape_cast %32 : vector<32xf32> to vector<32x1xf32>
      %cst_17 = arith.constant 3.200000e+01 : f32
      %34 = vector.broadcast %cst_17 : f32 to vector<32x1xf32>
      %35 = arith.divf %33, %34 : vector<32x1xf32>
      %cst_18 = arith.constant 9.99999974E-6 : f32
      %36 = vector.broadcast %cst_18 : f32 to vector<32x1xf32>
      %37 = arith.addf %35, %36 : vector<32x1xf32>
      %38 = math.rsqrt %37 : vector<32x1xf32>
      %39 = vector.broadcast %38 : vector<32x1xf32> to vector<32x32xf32>
      %40 = arith.mulf %30, %39 : vector<32x32xf32>
      %c0_19 = arith.constant 0 : index
      %c0_20 = arith.constant 0 : index
      %41 = vector.load %arg3[%c0_19, %c0_20] : memref<1x32xf32, #tpu.memory_space<vmem>>, vector<1x32xf32>
      %42 = vector.broadcast %41 : vector<1x32xf32> to vector<32x32xf32>
      %43 = arith.mulf %40, %42 : vector<32x32xf32>
      %c0_21 = arith.constant 0 : index
      %c0_22 = arith.constant 0 : index
      %44 = vector.load %arg4[%c0_21, %c0_22] : memref<1x32xf32, #tpu.memory_space<vmem>>, vector<1x32xf32>
      %45 = vector.broadcast %44 : vector<1x32xf32> to vector<32x32xf32>
      %46 = arith.addf %43, %45 : vector<32x32xf32>
      %47 = arith.truncf %46 : vector<32x32xf32> to vector<32x32xbf16>
      %c0_23 = arith.constant 0 : index
      %c0_24 = arith.constant 0 : index
      %48 = vector.load %arg8[%c0_23, %c0_24] : memref<32x32xbf16, #tpu.memory_space<vmem>>, vector<32x32xbf16>
      tpu.vector_store %arg8[%c0_23, %c0_24], %47 {strides = array<i32>} : memref<32x32xbf16, #tpu.memory_space<vmem>>, vector<32x32xbf16>,
    } else {
    }
    %c0 = arith.constant 0 : index
    %c0_1 = arith.constant 0 : index
    %3 = vector.load %arg8[%c0, %c0_1] : memref<32x32xbf16, #tpu.memory_space<vmem>>, vector<32x32xbf16>
    %c0_2 = arith.constant 0 : index
    %c0_3 = arith.constant 0 : index
    %4 = vector.load %arg5[%c0_2, %c0_3] : memref<32x128xbf16, #tpu.memory_space<vmem>>, vector<32x128xbf16>
    %cst = arith.constant dense<0.000000e+00> : vector<32x128xf32>
    %5 = tpu.matmul %3, %4, %cst {dimension_numbers = #tpu.dot_dimension_numbers<[1], [0], [0], [1], [0, 0, 1, 1], [], []>} : vector<32x32xbf16>, vector<32x128xbf16>, vector<32x128xf32> -> vector<32x128xf32>
    %c0_4 = arith.constant 0 : index
    %c0_5 = arith.constant 0 : index
    %6 = vector.load %arg6[%c0_4, %c0_5] : memref<1x128xf32, #tpu.memory_space<vmem>>, vector<1x128xf32>
    %7 = vector.broadcast %6 : vector<1x128xf32> to vector<32x128xf32>
    %8 = arith.addf %5, %7 : vector<32x128xf32>
    %9 = arith.mulf %8, %8 : vector<32x128xf32>
    %10 = arith.mulf %8, %9 : vector<32x128xf32>
    %cst_6 = arith.constant 4.471500e-02 : f32
    %11 = vector.broadcast %cst_6 : f32 to vector<32x128xf32>
    %12 = arith.mulf %11, %10 : vector<32x128xf32>
    %13 = arith.addf %8, %12 : vector<32x128xf32>
    %cst_7 = arith.constant 0.797884583 : f32
    %14 = vector.broadcast %cst_7 : f32 to vector<32x128xf32>
    %15 = arith.mulf %14, %13 : vector<32x128xf32>
    %16 = math.tanh %15 : vector<32x128xf32>
    %cst_8 = arith.constant 1.000000e+00 : f32
    %17 = vector.broadcast %cst_8 : f32 to vector<32x128xf32>
    %18 = arith.addf %17, %16 : vector<32x128xf32>
    %cst_9 = arith.constant 5.000000e-01 : f32
    %19 = vector.broadcast %cst_9 : f32 to vector<32x128xf32>
    %20 = arith.mulf %19, %18 : vector<32x128xf32>
    %21 = arith.mulf %8, %20 : vector<32x128xf32>
    %22 = arith.truncf %21 : vector<32x128xf32> to vector<32x128xbf16>
    %c0_10 = arith.constant 0 : index
    %c0_11 = arith.constant 0 : index
    %23 = vector.load %arg7[%c0_10, %c0_11] : memref<32x128xbf16, #tpu.memory_space<vmem>>, vector<32x128xbf16>
    tpu.vector_store %arg7[%c0_10, %c0_11], %22 {strides = array<i32>} : memref<32x128xbf16, #tpu.memory_space<vmem>>, vector<32x128xbf16>,
    return
  }
  func.func @transform_0(%arg0: i32, %arg1: i32) -> (i32, i32) {
    %c0_i32 = arith.constant 0 : i32
    %c0_i32_0 = arith.constant 0 : i32
    return %arg0, %c0_i32 : i32, i32
  }
  func.func @transform_1(%arg0: i32, %arg1: i32) -> (i32, i32) {
    %c0_i32 = arith.constant 0 : i32
    %c0_i32_0 = arith.constant 0 : i32
    %c0_i32_1 = arith.constant 0 : i32
    return %c0_i32, %c0_i32_0 : i32, i32
  }
  func.func @transform_2(%arg0: i32, %arg1: i32) -> (i32, i32) {
    %c0_i32 = arith.constant 0 : i32
    %c0_i32_0 = arith.constant 0 : i32
    %c0_i32_1 = arith.constant 0 : i32
    return %c0_i32, %c0_i32_0 : i32, i32
  }
  func.func @transform_3(%arg0: i32, %arg1: i32) -> (i32, i32) {
    %c0_i32 = arith.constant 0 : i32
    %c0_i32_0 = arith.constant 0 : i32
    return %c0_i32, %arg1 : i32, i32
  }
  func.func @transform_4(%arg0: i32, %arg1: i32) -> (i32, i32) {
    %c0_i32 = arith.constant 0 : i32
    %c0_i32_0 = arith.constant 0 : i32
    return %c0_i32, %arg1 : i32, i32
  }
  func.func @transform_5(%arg0: i32, %arg1: i32) -> (i32, i32) {
    %c0_i32 = arith.constant 0 : i32
    return %arg0, %arg1 : i32, i32
  }
}

module attributes {stable_mosaic.version = 11 : i64} {
  func.func @_matmul_k1_kernel(%arg0: i32, %arg1: i32, %arg2: memref<32x128xbf16, #tpu.memory_space<vmem>>, %arg3: memref<128x32xbf16, #tpu.memory_space<vmem>>, %arg4: memref<1x32xf32, #tpu.memory_space<vmem>>, %arg5: memref<32x32xf32, #tpu.memory_space<vmem>>, %arg6: memref<32x32xf32, #tpu.memory_space<vmem>>) attributes {dimension_semantics = [#tpu.dimension_semantics<parallel>, #tpu.dimension_semantics<parallel>], iteration_bounds = array<i64: 1, 1>, scalar_prefetch = 0 : i64, scratch_operands = 0 : i64, tpu.core_type = #tpu.core_type<tc>, window_params = [{transform_indices = @transform_0, window_bounds = array<i64: 32, 128>}, {transform_indices = @transform_1, window_bounds = array<i64: 128, 32>}, {transform_indices = @transform_2, window_bounds = array<i64: 1, 32>}, {transform_indices = @transform_3, window_bounds = array<i64: 32, 32>}, {transform_indices = @transform_4, window_bounds = array<i64: 32, 32>}]} {
    %c0 = arith.constant 0 : index
    %c0_0 = arith.constant 0 : index
    %0 = vector.load %arg2[%c0, %c0_0] : memref<32x128xbf16, #tpu.memory_space<vmem>>, vector<32x128xbf16>
    %c0_1 = arith.constant 0 : index
    %c0_2 = arith.constant 0 : index
    %1 = vector.load %arg3[%c0_1, %c0_2] : memref<128x32xbf16, #tpu.memory_space<vmem>>, vector<128x32xbf16>
    %cst = arith.constant dense<0.000000e+00> : vector<32x32xf32>
    %2 = tpu.matmul %0, %1, %cst {dimension_numbers = #tpu.dot_dimension_numbers<[1], [0], [0], [1], [0, 0, 1, 1], [], []>} : vector<32x128xbf16>, vector<128x32xbf16>, vector<32x32xf32> -> vector<32x32xf32>
    %c0_3 = arith.constant 0 : index
    %c0_4 = arith.constant 0 : index
    %3 = vector.load %arg4[%c0_3, %c0_4] : memref<1x32xf32, #tpu.memory_space<vmem>>, vector<1x32xf32>
    %4 = vector.broadcast %3 : vector<1x32xf32> to vector<32x32xf32>
    %5 = arith.addf %2, %4 : vector<32x32xf32>
    %c0_5 = arith.constant 0 : index
    %c0_6 = arith.constant 0 : index
    %6 = vector.load %arg5[%c0_5, %c0_6] : memref<32x32xf32, #tpu.memory_space<vmem>>, vector<32x32xf32>
    %7 = arith.addf %5, %6 : vector<32x32xf32>
    %c0_7 = arith.constant 0 : index
    %c0_8 = arith.constant 0 : index
    %8 = vector.load %arg6[%c0_7, %c0_8] : memref<32x32xf32, #tpu.memory_space<vmem>>, vector<32x32xf32>
    tpu.vector_store %arg6[%c0_7, %c0_8], %7 {strides = array<i32>} : memref<32x32xf32, #tpu.memory_space<vmem>>, vector<32x32xf32>,
    return
  }
  func.func @transform_0(%arg0: i32, %arg1: i32) -> (i32, i32) {
    %c0_i32 = arith.constant 0 : i32
    %c0_i32_0 = arith.constant 0 : i32
    return %arg0, %c0_i32 : i32, i32
  }
  func.func @transform_1(%arg0: i32, %arg1: i32) -> (i32, i32) {
    %c0_i32 = arith.constant 0 : i32
    %c0_i32_0 = arith.constant 0 : i32
    return %c0_i32, %arg1 : i32, i32
  }
  func.func @transform_2(%arg0: i32, %arg1: i32) -> (i32, i32) {
    %c0_i32 = arith.constant 0 : i32
    %c0_i32_0 = arith.constant 0 : i32
    return %c0_i32, %arg1 : i32, i32
  }
  func.func @transform_3(%arg0: i32, %arg1: i32) -> (i32, i32) {
    %c0_i32 = arith.constant 0 : i32
    return %arg0, %arg1 : i32, i32
  }
  func.func @transform_4(%arg0: i32, %arg1: i32) -> (i32, i32) {
    %c0_i32 = arith.constant 0 : i32
    return %arg0, %arg1 : i32, i32
  }
}

module attributes {stable_mosaic.version = 11 : i64} {
  func.func @_ln_matmul_kernel(%arg0: i32, %arg1: i32, %arg2: memref<32x32xf32, #tpu.memory_space<vmem>>, %arg3: memref<1x32xf32, #tpu.memory_space<vmem>>, %arg4: memref<1x32xf32, #tpu.memory_space<vmem>>, %arg5: memref<32x48xbf16, #tpu.memory_space<vmem>>, %arg6: memref<1x48xf32, #tpu.memory_space<vmem>>, %arg7: memref<32x48xf32, #tpu.memory_space<vmem>>, %arg8: memref<32x32xbf16, #tpu.memory_space<vmem>>) attributes {dimension_semantics = [#tpu.dimension_semantics<parallel>, #tpu.dimension_semantics<arbitrary>], iteration_bounds = array<i64: 1, 1>, scalar_prefetch = 0 : i64, scratch_operands = 1 : i64, tpu.core_type = #tpu.core_type<tc>, window_params = [{transform_indices = @transform_0, window_bounds = array<i64: 32, 32>}, {pipeline_mode = #tpu.pipeline_mode<synchronous>, transform_indices = @transform_1, window_bounds = array<i64: 1, 32>}, {pipeline_mode = #tpu.pipeline_mode<synchronous>, transform_indices = @transform_2, window_bounds = array<i64: 1, 32>}, {transform_indices = @transform_3, window_bounds = array<i64: 32, 48>}, {transform_indices = @transform_4, window_bounds = array<i64: 1, 48>}, {transform_indices = @transform_5, window_bounds = array<i64: 32, 48>}]} {
    %c0_i32 = arith.constant 0 : i32
    %0 = arith.cmpi eq, %arg1, %c0_i32 : i32
    %1 = arith.extui %0 : i1 to i32
    %c0_i32_0 = arith.constant 0 : i32
    %2 = arith.cmpi ne, %1, %c0_i32_0 : i32
    scf.if %2 {
      %c0_10 = arith.constant 0 : index
      %c0_11 = arith.constant 0 : index
      %14 = vector.load %arg2[%c0_10, %c0_11] : memref<32x32xf32, #tpu.memory_space<vmem>>, vector<32x32xf32>
      %cst_12 = arith.constant dense<0.000000e+00> : vector<32xf32>
      %15 = vector.multi_reduction <add>, %14, %cst_12 [1] : vector<32x32xf32> to vector<32xf32>
      %16 = vector.shape_cast %15 : vector<32xf32> to vector<32x1xf32>
      %cst_13 = arith.constant 3.200000e+01 : f32
      %17 = vector.broadcast %cst_13 : f32 to vector<32x1xf32>
      %18 = arith.divf %16, %17 : vector<32x1xf32>
      %19 = vector.broadcast %18 : vector<32x1xf32> to vector<32x32xf32>
      %20 = arith.subf %14, %19 : vector<32x32xf32>
      %21 = arith.mulf %20, %20 : vector<32x32xf32>
      %cst_14 = arith.constant dense<0.000000e+00> : vector<32xf32>
      %22 = vector.multi_reduction <add>, %21, %cst_14 [1] : vector<32x32xf32> to vector<32xf32>
      %23 = vector.shape_cast %22 : vector<32xf32> to vector<32x1xf32>
      %cst_15 = arith.constant 3.200000e+01 : f32
      %24 = vector.broadcast %cst_15 : f32 to vector<32x1xf32>
      %25 = arith.divf %23, %24 : vector<32x1xf32>
      %cst_16 = arith.constant 9.99999974E-6 : f32
      %26 = vector.broadcast %cst_16 : f32 to vector<32x1xf32>
      %27 = arith.addf %25, %26 : vector<32x1xf32>
      %28 = math.rsqrt %27 : vector<32x1xf32>
      %29 = vector.broadcast %28 : vector<32x1xf32> to vector<32x32xf32>
      %30 = arith.mulf %20, %29 : vector<32x32xf32>
      %c0_17 = arith.constant 0 : index
      %c0_18 = arith.constant 0 : index
      %31 = vector.load %arg3[%c0_17, %c0_18] : memref<1x32xf32, #tpu.memory_space<vmem>>, vector<1x32xf32>
      %32 = vector.broadcast %31 : vector<1x32xf32> to vector<32x32xf32>
      %33 = arith.mulf %30, %32 : vector<32x32xf32>
      %c0_19 = arith.constant 0 : index
      %c0_20 = arith.constant 0 : index
      %34 = vector.load %arg4[%c0_19, %c0_20] : memref<1x32xf32, #tpu.memory_space<vmem>>, vector<1x32xf32>
      %35 = vector.broadcast %34 : vector<1x32xf32> to vector<32x32xf32>
      %36 = arith.addf %33, %35 : vector<32x32xf32>
      %37 = arith.truncf %36 : vector<32x32xf32> to vector<32x32xbf16>
      %c0_21 = arith.constant 0 : index
      %c0_22 = arith.constant 0 : index
      %38 = vector.load %arg8[%c0_21, %c0_22] : memref<32x32xbf16, #tpu.memory_space<vmem>>, vector<32x32xbf16>
      tpu.vector_store %arg8[%c0_21, %c0_22], %37 {strides = array<i32>} : memref<32x32xbf16, #tpu.memory_space<vmem>>, vector<32x32xbf16>,
    } else {
    }
    %c0 = arith.constant 0 : index
    %c0_1 = arith.constant 0 : index
    %3 = vector.load %arg8[%c0, %c0_1] : memref<32x32xbf16, #tpu.memory_space<vmem>>, vector<32x32xbf16>
    %c0_2 = arith.constant 0 : index
    %c0_3 = arith.constant 0 : index
    %4 = vector.load %arg5[%c0_2, %c0_3] : memref<32x48xbf16, #tpu.memory_space<vmem>>, vector<32x48xbf16>
    %cst = arith.constant dense<0.000000e+00> : vector<32x48xf32>
    %5 = tpu.matmul %3, %4, %cst {dimension_numbers = #tpu.dot_dimension_numbers<[1], [0], [0], [1], [0, 0, 1, 1], [], []>} : vector<32x32xbf16>, vector<32x48xbf16>, vector<32x48xf32> -> vector<32x48xf32>
    %c0_4 = arith.constant 0 : index
    %c0_5 = arith.constant 0 : index
    %6 = vector.load %arg6[%c0_4, %c0_5] : memref<1x48xf32, #tpu.memory_space<vmem>>, vector<1x48xf32>
    %7 = vector.broadcast %6 : vector<1x48xf32> to vector<32x48xf32>
    %8 = arith.addf %5, %7 : vector<32x48xf32>
    %cst_6 = arith.constant -1.000000e+00 : f32
    %cst_7 = arith.constant 1.000000e+00 : f32
    %9 = vector.broadcast %cst_6 : f32 to vector<32x48xf32>
    %10 = arith.maximumf %9, %8 : vector<32x48xf32>
    %11 = vector.broadcast %cst_7 : f32 to vector<32x48xf32>
    %12 = arith.minimumf %11, %10 : vector<32x48xf32>
    %c0_8 = arith.constant 0 : index
    %c0_9 = arith.constant 0 : index
    %13 = vector.load %arg7[%c0_8, %c0_9] : memref<32x48xf32, #tpu.memory_space<vmem>>, vector<32x48xf32>
    tpu.vector_store %arg7[%c0_8, %c0_9], %12 {strides = array<i32>} : memref<32x48xf32, #tpu.memory_space<vmem>>, vector<32x48xf32>,
    return
  }
  func.func @transform_0(%arg0: i32, %arg1: i32) -> (i32, i32) {
    %c0_i32 = arith.constant 0 : i32
    %c0_i32_0 = arith.constant 0 : i32
    return %arg0, %c0_i32 : i32, i32
  }
  func.func @transform_1(%arg0: i32, %arg1: i32) -> (i32, i32) {
    %c0_i32 = arith.constant 0 : i32
    %c0_i32_0 = arith.constant 0 : i32
    %c0_i32_1 = arith.constant 0 : i32
    return %c0_i32, %c0_i32_0 : i32, i32
  }
  func.func @transform_2(%arg0: i32, %arg1: i32) -> (i32, i32) {
    %c0_i32 = arith.constant 0 : i32
    %c0_i32_0 = arith.constant 0 : i32
    %c0_i32_1 = arith.constant 0 : i32
    return %c0_i32, %c0_i32_0 : i32, i32
  }
  func.func @transform_3(%arg0: i32, %arg1: i32) -> (i32, i32) {
    %c0_i32 = arith.constant 0 : i32
    %c0_i32_0 = arith.constant 0 : i32
    return %c0_i32, %arg1 : i32, i32
  }
  func.func @transform_4(%arg0: i32, %arg1: i32) -> (i32, i32) {
    %c0_i32 = arith.constant 0 : i32
    %c0_i32_0 = arith.constant 0 : i32
    return %c0_i32, %arg1 : i32, i32
  }
  func.func @transform_5(%arg0: i32, %arg1: i32) -> (i32, i32) {
    %c0_i32 = arith.constant 0 : i32
    return %arg0, %arg1 : i32, i32
  }
}

module attributes {stable_mosaic.version = 11 : i64} {
  func.func @_fsq_kernel(%arg0: i32, %arg1: memref<1x16x32xf32, #tpu.memory_space<vmem>>, %arg2: memref<1x32xf32, #tpu.memory_space<vmem>>, %arg3: memref<1x32xf32, #tpu.memory_space<vmem>>, %arg4: memref<32x4xf32, #tpu.memory_space<vmem>>, %arg5: memref<1x4xf32, #tpu.memory_space<vmem>>, %arg6: memref<5x4xf32, #tpu.memory_space<vmem>>, %arg7: memref<4x32xf32, #tpu.memory_space<vmem>>, %arg8: memref<1x32xf32, #tpu.memory_space<vmem>>, %arg9: memref<16x32xf32, #tpu.memory_space<vmem>>, %arg10: memref<1x16x32xf32, #tpu.memory_space<vmem>>, %arg11: memref<1x16x1xi32, #tpu.memory_space<vmem>>) attributes {dimension_semantics = [#tpu.dimension_semantics<parallel>], iteration_bounds = array<i64: 2>, scalar_prefetch = 0 : i64, scratch_operands = 0 : i64, tpu.core_type = #tpu.core_type<tc>, window_params = [{transform_indices = @transform_0, window_bounds = array<i64: 1, 16, 32>}, {pipeline_mode = #tpu.pipeline_mode<synchronous>, transform_indices = @transform_1, window_bounds = array<i64: 1, 32>}, {pipeline_mode = #tpu.pipeline_mode<synchronous>, transform_indices = @transform_2, window_bounds = array<i64: 1, 32>}, {pipeline_mode = #tpu.pipeline_mode<synchronous>, transform_indices = @transform_3, window_bounds = array<i64: 32, 4>}, {pipeline_mode = #tpu.pipeline_mode<synchronous>, transform_indices = @transform_4, window_bounds = array<i64: 1, 4>}, {pipeline_mode = #tpu.pipeline_mode<synchronous>, transform_indices = @transform_5, window_bounds = array<i64: 5, 4>}, {pipeline_mode = #tpu.pipeline_mode<synchronous>, transform_indices = @transform_6, window_bounds = array<i64: 4, 32>}, {pipeline_mode = #tpu.pipeline_mode<synchronous>, transform_indices = @transform_7, window_bounds = array<i64: 1, 32>}, {pipeline_mode = #tpu.pipeline_mode<synchronous>, transform_indices = @transform_8, window_bounds = array<i64: 16, 32>}, {transform_indices = @transform_9, window_bounds = array<i64: 1, 16, 32>}, {transform_indices = @transform_10, window_bounds = array<i64: 1, 16, 1>}]} {
    %c0 = arith.constant 0 : index
    %c0_0 = arith.constant 0 : index
    %c0_1 = arith.constant 0 : index
    %0 = vector.load %arg1[%c0, %c0_0, %c0_1] : memref<1x16x32xf32, #tpu.memory_space<vmem>>, vector<1x16x32xf32>
    %1 = vector.shape_cast %0 : vector<1x16x32xf32> to vector<16x32xf32>
    %cst = arith.constant dense<0.000000e+00> : vector<16xf32>
    %2 = vector.multi_reduction <add>, %1, %cst [1] : vector<16x32xf32> to vector<16xf32>
    %3 = vector.shape_cast %2 : vector<16xf32> to vector<16x1xf32>
    %cst_2 = arith.constant 3.200000e+01 : f32
    %4 = vector.broadcast %cst_2 : f32 to vector<16x1xf32>
    %5 = arith.divf %3, %4 : vector<16x1xf32>
    %6 = vector.broadcast %5 : vector<16x1xf32> to vector<16x32xf32>
    %7 = arith.subf %1, %6 : vector<16x32xf32>
    %8 = arith.mulf %7, %7 : vector<16x32xf32>
    %cst_3 = arith.constant dense<0.000000e+00> : vector<16xf32>
    %9 = vector.multi_reduction <add>, %8, %cst_3 [1] : vector<16x32xf32> to vector<16xf32>
    %10 = vector.shape_cast %9 : vector<16xf32> to vector<16x1xf32>
    %cst_4 = arith.constant 3.200000e+01 : f32
    %11 = vector.broadcast %cst_4 : f32 to vector<16x1xf32>
    %12 = arith.divf %10, %11 : vector<16x1xf32>
    %cst_5 = arith.constant 9.99999974E-6 : f32
    %13 = vector.broadcast %cst_5 : f32 to vector<16x1xf32>
    %14 = arith.addf %12, %13 : vector<16x1xf32>
    %15 = math.rsqrt %14 : vector<16x1xf32>
    %16 = vector.broadcast %15 : vector<16x1xf32> to vector<16x32xf32>
    %17 = arith.mulf %7, %16 : vector<16x32xf32>
    %c0_6 = arith.constant 0 : index
    %c0_7 = arith.constant 0 : index
    %18 = vector.load %arg2[%c0_6, %c0_7] : memref<1x32xf32, #tpu.memory_space<vmem>>, vector<1x32xf32>
    %19 = vector.broadcast %18 : vector<1x32xf32> to vector<16x32xf32>
    %20 = arith.mulf %17, %19 : vector<16x32xf32>
    %c0_8 = arith.constant 0 : index
    %c0_9 = arith.constant 0 : index
    %21 = vector.load %arg3[%c0_8, %c0_9] : memref<1x32xf32, #tpu.memory_space<vmem>>, vector<1x32xf32>
    %22 = vector.broadcast %21 : vector<1x32xf32> to vector<16x32xf32>
    %23 = arith.addf %20, %22 : vector<16x32xf32>
    %c0_10 = arith.constant 0 : index
    %c0_11 = arith.constant 0 : index
    %24 = vector.load %arg4[%c0_10, %c0_11] : memref<32x4xf32, #tpu.memory_space<vmem>>, vector<32x4xf32>
    %cst_12 = arith.constant dense<0.000000e+00> : vector<16x4xf32>
    %25 = tpu.matmul %23, %24, %cst_12 {dimension_numbers = #tpu.dot_dimension_numbers<[1], [0], [0], [1], [0, 0, 1, 1], [], []>} : vector<16x32xf32>, vector<32x4xf32>, vector<16x4xf32> -> vector<16x4xf32>
    %c0_13 = arith.constant 0 : index
    %c0_14 = arith.constant 0 : index
    %26 = vector.load %arg5[%c0_13, %c0_14] : memref<1x4xf32, #tpu.memory_space<vmem>>, vector<1x4xf32>
    %27 = vector.broadcast %26 : vector<1x4xf32> to vector<16x4xf32>
    %28 = arith.addf %25, %27 : vector<16x4xf32>
    %c0_15 = arith.constant 0 : index
    %c0_16 = arith.constant 0 : index
    %29 = vector.load %arg6[%c0_15, %c0_16] : memref<5x4xf32, #tpu.memory_space<vmem>>, vector<1x4xf32>
    %c1 = arith.constant 1 : index
    %c0_17 = arith.constant 0 : index
    %30 = vector.load %arg6[%c1, %c0_17] : memref<5x4xf32, #tpu.memory_space<vmem>>, vector<1x4xf32>
    %c2 = arith.constant 2 : index
    %c0_18 = arith.constant 0 : index
    %31 = vector.load %arg6[%c2, %c0_18] : memref<5x4xf32, #tpu.memory_space<vmem>>, vector<1x4xf32>
    %c3 = arith.constant 3 : index
    %c0_19 = arith.constant 0 : index
    %32 = vector.load %arg6[%c3, %c0_19] : memref<5x4xf32, #tpu.memory_space<vmem>>, vector<1x4xf32>
    %c4 = arith.constant 4 : index
    %c0_20 = arith.constant 0 : index
    %33 = vector.load %arg6[%c4, %c0_20] : memref<5x4xf32, #tpu.memory_space<vmem>>, vector<1x4xf32>
    %34 = vector.broadcast %31 : vector<1x4xf32> to vector<16x4xf32>
    %35 = arith.addf %28, %34 : vector<16x4xf32>
    %36 = math.tanh %35 : vector<16x4xf32>
    %37 = vector.broadcast %29 : vector<1x4xf32> to vector<16x4xf32>
    %38 = arith.mulf %36, %37 : vector<16x4xf32>
    %39 = vector.broadcast %30 : vector<1x4xf32> to vector<16x4xf32>
    %40 = arith.subf %38, %39 : vector<16x4xf32>
    %cst_21 = arith.constant 5.000000e-01 : f32
    %41 = vector.broadcast %cst_21 : f32 to vector<16x4xf32>
    %42 = arith.addf %40, %41 : vector<16x4xf32>
    %43 = math.floor %42 : vector<16x4xf32>
    %44 = vector.broadcast %32 : vector<1x4xf32> to vector<16x4xf32>
    %45 = arith.addf %43, %44 : vector<16x4xf32>
    %46 = vector.broadcast %33 : vector<1x4xf32> to vector<16x4xf32>
    %47 = arith.mulf %45, %46 : vector<16x4xf32>
    %cst_22 = arith.constant dense<0.000000e+00> : vector<16xf32>
    %48 = vector.multi_reduction <add>, %47, %cst_22 [1] : vector<16x4xf32> to vector<16xf32>
    %49 = vector.shape_cast %48 : vector<16xf32> to vector<16x1xf32>
    %50 = arith.fptosi %49 : vector<16x1xf32> to vector<16x1xi32>
    %c0_23 = arith.constant 0 : index
    %c0_24 = arith.constant 0 : index
    %c0_25 = arith.constant 0 : index
    %51 = vector.load %arg11[%c0_23, %c0_24, %c0_25] : memref<1x16x1xi32, #tpu.memory_space<vmem>>, vector<1x16x1xi32>
    %52 = vector.shape_cast %51 : vector<1x16x1xi32> to vector<16x1xi32>
    %53 = vector.shape_cast %50 : vector<16x1xi32> to vector<1x16x1xi32>
    tpu.vector_store %arg11[%c0_23, %c0_24, %c0_25], %53 {strides = array<i32>} : memref<1x16x1xi32, #tpu.memory_space<vmem>>, vector<1x16x1xi32>,
    %54 = vector.broadcast %32 : vector<1x4xf32> to vector<16x4xf32>
    %55 = arith.divf %43, %54 : vector<16x4xf32>
    %c0_26 = arith.constant 0 : index
    %c0_27 = arith.constant 0 : index
    %56 = vector.load %arg8[%c0_26, %c0_27] : memref<1x32xf32, #tpu.memory_space<vmem>>, vector<1x32xf32>
    %c0_28 = arith.constant 0 : index
    %c0_29 = arith.constant 0 : index
    %57 = vector.load %arg9[%c0_28, %c0_29] : memref<16x32xf32, #tpu.memory_space<vmem>>, vector<16x32xf32>
    %58 = vector.broadcast %56 : vector<1x32xf32> to vector<16x32xf32>
    %59 = arith.addf %58, %57 : vector<16x32xf32>
    %60 = vector.extract_strided_slice %55 {offsets = [0, 0], sizes = [16, 1], strides = [1, 1]} : vector<16x4xf32> to vector<16x1xf32>
    %c0_30 = arith.constant 0 : index
    %c0_31 = arith.constant 0 : index
    %61 = vector.load %arg7[%c0_30, %c0_31] : memref<4x32xf32, #tpu.memory_space<vmem>>, vector<1x32xf32>
    %62 = vector.broadcast %60 : vector<16x1xf32> to vector<16x32xf32>
    %63 = vector.broadcast %61 : vector<1x32xf32> to vector<16x32xf32>
    %64 = arith.mulf %62, %63 : vector<16x32xf32>
    %65 = arith.addf %59, %64 : vector<16x32xf32>
    %66 = vector.extract_strided_slice %55 {offsets = [0, 1], sizes = [16, 1], strides = [1, 1]} : vector<16x4xf32> to vector<16x1xf32>
    %c1_32 = arith.constant 1 : index
    %c0_33 = arith.constant 0 : index
    %67 = vector.load %arg7[%c1_32, %c0_33] : memref<4x32xf32, #tpu.memory_space<vmem>>, vector<1x32xf32>
    %68 = vector.broadcast %66 : vector<16x1xf32> to vector<16x32xf32>
    %69 = vector.broadcast %67 : vector<1x32xf32> to vector<16x32xf32>
    %70 = arith.mulf %68, %69 : vector<16x32xf32>
    %71 = arith.addf %65, %70 : vector<16x32xf32>
    %72 = vector.extract_strided_slice %55 {offsets = [0, 2], sizes = [16, 1], strides = [1, 1]} : vector<16x4xf32> to vector<16x1xf32>
    %c2_34 = arith.constant 2 : index
    %c0_35 = arith.constant 0 : index
    %73 = vector.load %arg7[%c2_34, %c0_35] : memref<4x32xf32, #tpu.memory_space<vmem>>, vector<1x32xf32>
    %74 = vector.broadcast %72 : vector<16x1xf32> to vector<16x32xf32>
    %75 = vector.broadcast %73 : vector<1x32xf32> to vector<16x32xf32>
    %76 = arith.mulf %74, %75 : vector<16x32xf32>
    %77 = arith.addf %71, %76 : vector<16x32xf32>
    %78 = vector.extract_strided_slice %55 {offsets = [0, 3], sizes = [16, 1], strides = [1, 1]} : vector<16x4xf32> to vector<16x1xf32>
    %c3_36 = arith.constant 3 : index
    %c0_37 = arith.constant 0 : index
    %79 = vector.load %arg7[%c3_36, %c0_37] : memref<4x32xf32, #tpu.memory_space<vmem>>, vector<1x32xf32>
    %80 = vector.broadcast %78 : vector<16x1xf32> to vector<16x32xf32>
    %81 = vector.broadcast %79 : vector<1x32xf32> to vector<16x32xf32>
    %82 = arith.mulf %80, %81 : vector<16x32xf32>
    %83 = arith.addf %77, %82 : vector<16x32xf32>
    %c0_38 = arith.constant 0 : index
    %c0_39 = arith.constant 0 : index
    %c0_40 = arith.constant 0 : index
    %84 = vector.load %arg10[%c0_38, %c0_39, %c0_40] : memref<1x16x32xf32, #tpu.memory_space<vmem>>, vector<1x16x32xf32>
    %85 = vector.shape_cast %84 : vector<1x16x32xf32> to vector<16x32xf32>
    %86 = vector.shape_cast %83 : vector<16x32xf32> to vector<1x16x32xf32>
    tpu.vector_store %arg10[%c0_38, %c0_39, %c0_40], %86 {strides = array<i32>} : memref<1x16x32xf32, #tpu.memory_space<vmem>>, vector<1x16x32xf32>,
    return
  }
  func.func @transform_0(%arg0: i32) -> (i32, i32, i32) {
    %c0_i32 = arith.constant 0 : i32
    %c0_i32_0 = arith.constant 0 : i32
    %c0_i32_1 = arith.constant 0 : i32
    return %arg0, %c0_i32, %c0_i32_0 : i32, i32, i32
  }
  func.func @transform_1(%arg0: i32) -> (i32, i32) {
    %c0_i32 = arith.constant 0 : i32
    %c0_i32_0 = arith.constant 0 : i32
    %c0_i32_1 = arith.constant 0 : i32
    return %c0_i32, %c0_i32_0 : i32, i32
  }
  func.func @transform_2(%arg0: i32) -> (i32, i32) {
    %c0_i32 = arith.constant 0 : i32
    %c0_i32_0 = arith.constant 0 : i32
    %c0_i32_1 = arith.constant 0 : i32
    return %c0_i32, %c0_i32_0 : i32, i32
  }
  func.func @transform_3(%arg0: i32) -> (i32, i32) {
    %c0_i32 = arith.constant 0 : i32
    %c0_i32_0 = arith.constant 0 : i32
    %c0_i32_1 = arith.constant 0 : i32
    return %c0_i32, %c0_i32_0 : i32, i32
  }
  func.func @transform_4(%arg0: i32) -> (i32, i32) {
    %c0_i32 = arith.constant 0 : i32
    %c0_i32_0 = arith.constant 0 : i32
    %c0_i32_1 = arith.constant 0 : i32
    return %c0_i32, %c0_i32_0 : i32, i32
  }
  func.func @transform_5(%arg0: i32) -> (i32, i32) {
    %c0_i32 = arith.constant 0 : i32
    %c0_i32_0 = arith.constant 0 : i32
    %c0_i32_1 = arith.constant 0 : i32
    return %c0_i32, %c0_i32_0 : i32, i32
  }
  func.func @transform_6(%arg0: i32) -> (i32, i32) {
    %c0_i32 = arith.constant 0 : i32
    %c0_i32_0 = arith.constant 0 : i32
    %c0_i32_1 = arith.constant 0 : i32
    return %c0_i32, %c0_i32_0 : i32, i32
  }
  func.func @transform_7(%arg0: i32) -> (i32, i32) {
    %c0_i32 = arith.constant 0 : i32
    %c0_i32_0 = arith.constant 0 : i32
    %c0_i32_1 = arith.constant 0 : i32
    return %c0_i32, %c0_i32_0 : i32, i32
  }
  func.func @transform_8(%arg0: i32) -> (i32, i32) {
    %c0_i32 = arith.constant 0 : i32
    %c0_i32_0 = arith.constant 0 : i32
    %c0_i32_1 = arith.constant 0 : i32
    return %c0_i32, %c0_i32_0 : i32, i32
  }
  func.func @transform_9(%arg0: i32) -> (i32, i32, i32) {
    %c0_i32 = arith.constant 0 : i32
    %c0_i32_0 = arith.constant 0 : i32
    %c0_i32_1 = arith.constant 0 : i32
    return %arg0, %c0_i32, %c0_i32_0 : i32, i32, i32
  }
  func.func @transform_10(%arg0: i32) -> (i32, i32, i32) {
    %c0_i32 = arith.constant 0 : i32
    %c0_i32_0 = arith.constant 0 : i32
    %c0_i32_1 = arith.constant 0 : i32
    return %arg0, %c0_i32, %c0_i32_0 : i32, i32, i32
  }
}

</mosaic_0001>

<bundles_post_ra>
// kernel: forward.15
= control target key start
LH: loop header
LB: loop body
LE: loop exit
PB: predicated region body
PF: predicated region fallthrough
CT: control target
= control target key end

     0   :  { %s381_s15 = smov 0   ;;  %s416_s0 = inlined_call_operand.vmem [shape: f32[2,16,48], index: 0, kind: input, shape index: {}]   ;;  %s417_s1 = inlined_call_operand.vmem [shape: bf16[48,32], index: 1, kind: input, shape index: {}]   ;;  %s418_s2 = inlined_call_operand.vmem [shape: f32[1,32], index: 2, kind: input, shape index: {}]   ;;  %s419_s3 = inlined_call_operand.vmem [shape: f32[16,32], index: 3, kind: input, shape index: {}]   ;;  %s420_s4 = inlined_call_operand.vmem [shape: f32[2,16,32], index: 4, kind: output, shape index: {}]  }
   0x1 LB: > { %s310_s16 = sadd.s32 4294967295, %s354_s15   ;;  %p314_p0 = scmp.ge.s32.totalorder %s354_s15, 1  ;;  %s354_s15 = sphi %s381_s15, %s14_s15  }
   0x2   : > { %p162_p1 = scmp.lt.s32.totalorder %s354_s15, 3 }
   0x4   : > { %p163_p2 = pnand %p314_p0, %p162_p1 }
   0x5   : > { %p188_p3 = scmp.lt.s32.totalorder (!%p163_p2), %s310_s16, 1 }
   0x6   : > { %166 = sbr.rel (%p163_p2) target bundleno = 162 (0xa2), region = 36 }
   0xb   : > { %v338_v0 = vld [vmem:[%s417_s1 + $0x10] sm:$0xff]  ;;  %v337_v1 = vld [vmem:[%s417_s1 + $0x8] sm:$0xff]  ;;  %s422_s16 = smov (!%p188_p3, %s310_s16), 1  ;;  %v336_v2 = vld [vmem:[%s417_s1] sm:$0xff]  ;;  %vm230_vm0 = vcmask 392192   ;;  %vm252_vm1 = vcmask 261120  }
   0xc   : > { %239 = vmatpush.bf16.msra.mxu0 %v338_v0  ;;  %s334_s21 = sshll.u32 %s422_s16, 4  ;;  %v347_v6 = vld [vmem:[%s418_s2] ss:$0 sm:$0xff]  ;;  %v249_v12 = vld [vmem:[%s419_s3 + $0x8] sm:$0xff] }
   0xd   : > { %s192_s24 = scalar_lea.vmem %s416_s0, %s334_s21  ;;  %v248_v8 = vld [vmem:[%s419_s3] sm:$0xff]  ;;  %s197_s7 = scalar_lea.vmem %s420_s4, %s334_s21 }
   0xe   : > { %v199_v3 = vld [vmem:[%s192_s24] sm:$0xff]  ;;  %v200_v4 = vld [vmem:[%s192_s24 + $0x8] sm:$0xff] }
   0xf   : > { %v201_v5 = vpack.c.bf16 %v200_v4, %v199_v3 }
  0x10   : > { %240 = vmatpush.bf16.msra.mxu0 %v337_v1 }
  0x14   : > { %241 = vmatpush.bf16.msra.mxu0 %v336_v2 }
  0x17   : > { %331 = vmatmul.msk.bf16.vlgmr.msra.gmra.mxu0 %vm230_vm0, %v201_v5 }
  0x94   : > { %v243_v7 = vpop.f32.mrf.mxu0 }
  0x95   : > { %v244_v9 = vadd.f32 %v347_v6, %v243_v7 }
  0x97   : > { %v250_v10 = vadd.f32 %v248_v8, %v244_v9 }
  0x99   : > { %253 = vst.msk [vmem:[%s197_s7] sm:$0xff] %vm252_vm1, %v250_v10 }
  0x9c   : > { %v245_v11 = vpop.f32.mrf.mxu0 }
  0x9d   : > { %v246_v13 = vadd.f32 %v347_v6, %v245_v11 }
  0x9f   : > { %v251_v14 = vadd.f32 %v249_v12, %v246_v13 }
  0xa1   : > { %254 = vst.msk [vmem:[%s197_s7 + $0x8] sm:$0xff] %vm252_vm1, %v251_v14 }
  0xa2 PF: > { %s14_s15 = sadd.s32 1, %s354_s15  }
  0xa3   : > { %p11_p4 = scmp.ge.s32.totalorder %s14_s15, 4  }
  0xa5   :  { %13 = sbr.rel (!%p11_p4) target bundleno = 1 (0x1), region = 66 }

// kernel: forward.17
= control target key start
LH: loop header
LB: loop body
LE: loop exit
PB: predicated region body
PF: predicated region fallthrough
CT: control target
= control target key end

     0   :  { %vm29_vm0 = vcmask 261120   ;;  %v315_v8 = vmov 32.0   ;;  %vm145_vm10 = vcmask 257024   ;;  %s413_s0 = inlined_call_operand.vmem [shape: f32[32,32], index: 0, kind: input, shape index: {}]   ;;  %s414_s1 = inlined_call_operand.vmem [shape: f32[1,32], index: 1, kind: input, shape index: {}]   ;;  %s415_s2 = inlined_call_operand.vmem [shape: f32[1,32], index: 2, kind: input, shape index: {}]   ;;  %s416_s4 = inlined_call_operand.vmem [shape: f32[1,128], index: 4, kind: input, shape index: {}]   ;;  %s417_s3 = inlined_call_operand.vmem [shape: bf16[32,128], index: 3, kind: input, shape index: {}]   ;;  %s418_s5 = inlined_call_operand.vmem [shape: bf16[32,128], index: 5, kind: output, shape index: {}]  }
   0x1   :  { %v27_v0 = vld [vmem:[%s413_s0 + $0x10] sm:$0xff]  ;;  %v25_v1 = vld [vmem:[%s413_s0] sm:$0xff]  ;;  %v28_v4 = vld [vmem:[%s413_s0 + $0x18] sm:$0xff]  ;;  %297 = vrcp.f32 %v315_v8 }
   0x2   :  { %v36_v2 = vsel %vm29_vm0, %v27_v0, 0.0  ;;  %v30_v3 = vsel %vm29_vm0, %v25_v1, 0.0  ;;  %v26_v5 = vld [vmem:[%s413_s0 + $0x8] sm:$0xff]  ;;  %v39_v6 = vsel %vm29_vm0, %v28_v4, 0.0  ;;  %v278_v46 = vld [vmem:[%s417_s3] sm:$0xff] }
   0x3   :  { %37 = vadd.xlane.f32.xlu1 %v36_v2  ;;  %31 = vadd.xlane.f32.xlu0 %v30_v3  ;;  %v33_v7 = vsel %vm29_vm0, %v26_v5, 0.0  ;;  %v279_v43 = vld [vmem:[%s417_s3 + $0x8] sm:$0xff]  ;;  %v294_v63 = vld [vmem:[%s414_s1] ss:$0 sm:$0xff] }
   0x4   :  { %197 = vmatpush.bf16.msra.mxu0 %v279_v43  ;;  %291 = vmatpush.bf16.msra.mxu1 %v279_v43 }
   0x7   :  { %v298_v9 = vpop.eup %297 }
   0x8   :  { %v43_v10 = vmul.f32 32.0, %v298_v9  ;;  %vm47_vm1 = vweird.f32 %v298_v9  ;;  %198 = vmatpush.bf16.msra.mxu0 %v278_v46  ;;  %292 = vmatpush.bf16.msra.mxu1 %v278_v46 }
   0xa   :  { %v44_v11 = vsub.f32 1.0, %v43_v10 }
   0xb   :  { %40 = vadd.xlane.f32.xlu1 %v39_v6  ;;  %34 = vadd.xlane.f32.xlu0 %v33_v7 }
   0xc   :  { %v45_v12 = vmul.f32 %v298_v9, %v44_v11 }
   0xe   :  { %v46_v13 = vadd.f32 %v298_v9, %v45_v12 }
  0x10   :  { %v48_v14 = vsel %vm47_vm1, %v298_v9, %v46_v13 }
  0x76   :  { %v38_v15 = vpop.xlane.xlu1 %37  ;;  %v32_v16 = vpop.xlane.xlu0 %31 }
  0x77   :  { %v51_v17 = vmul.f32 %v48_v14, %v38_v15  ;;  %v49_v18 = vmul.f32 %v48_v14, %v32_v16 }
  0x79   :  { %v362_v19 = vsub.f32 %v27_v0, %v51_v17  ;;  %v364_v20 = vsub.f32 %v25_v1, %v49_v18 }
  0x7b   :  { %v59_v21 = vmul.f32 %v362_v19, %v362_v19  ;;  %v57_v22 = vmul.f32 %v364_v20, %v364_v20 }
  0x7d   :  { %v67_v23 = vsel %vm29_vm0, %v59_v21, 0.0  ;;  %v61_v24 = vsel %vm29_vm0, %v57_v22, 0.0 }
  0x7e   :  { %v41_v25 = vpop.xlane.xlu1 %40  ;;  %68 = vadd.xlane.f32.xlu0 %v67_v23  ;;  %62 = vadd.xlane.f32.xlu2 %v61_v24  ;;  %v35_v26 = vpop.xlane.xlu0 %34 }
  0x7f   :  { %v52_v27 = vmul.f32 %v48_v14, %v41_v25  ;;  %v50_v28 = vmul.f32 %v48_v14, %v35_v26 }
  0x81   :  { %v372_v29 = vsub.f32 %v28_v4, %v52_v27  ;;  %v374_v30 = vsub.f32 %v26_v5, %v50_v28  ;;  %v295_v4 = vld [vmem:[%s415_s2] ss:$0 sm:$0xff] }
  0x83   :  { %v60_v31 = vmul.f32 %v372_v29, %v372_v29  ;;  %v58_v32 = vmul.f32 %v374_v30, %v374_v30 }
  0x85   :  { %v70_v33 = vsel %vm29_vm0, %v60_v31, 0.0  ;;  %v64_v34 = vsel %vm29_vm0, %v58_v32, 0.0 }
  0x86   :  { %71 = vadd.xlane.f32.xlu1 %v70_v33  ;;  %65 = vadd.xlane.f32.xlu2 %v64_v34 }
  0xf1   :  { %v63_v35 = vpop.xlane.xlu2 %62  ;;  %v69_v36 = vpop.xlane.xlu0 %68 }
  0xf2   :  { %v73_v37 = vmul.f32 %v63_v35, %v48_v14  ;;  %v75_v38 = vmul.f32 %v69_v36, %v48_v14 }
  0xf4   :  { %v77_v39 = vadd.f32 1e-05, %v73_v37  ;;  %v79_v40 = vadd.f32 1e-05, %v75_v38 }
  0xf6   :  { %299 = vrsqrt.f32 %v77_v39  ;;  %vm87_vm4 = vweird.f32 %v77_v39  ;;  %vm107_vm6 = vweird.f32 %v79_v40 }
  0xf7   :  { %301 = vrsqrt.f32 %v79_v40 }
  0xf9   :  { %v72_v41 = vpop.xlane.xlu1 %71  ;;  %v66_v42 = vpop.xlane.xlu2 %65 }
  0xfa   :  { %v76_v44 = vmul.f32 %v72_v41, %v48_v14  ;;  %v74_v45 = vmul.f32 %v66_v42, %v48_v14 }
  0xfc   :  { %v300_v47 = vpop.eup %299  ;;  %v80_v48 = vadd.f32 1e-05, %v76_v44  ;;  %v78_v49 = vadd.f32 1e-05, %v74_v45 }
  0xfd   :  { %v302_v50 = vpop.eup %301  ;;  %v82_v51 = vmul.f32 %v300_v47, %v77_v39  ;;  %vm88_vm2 = vweird.f32 %v300_v47 }
  0xfe   :  { %v102_v52 = vmul.f32 %v302_v50, %v79_v40  ;;  %303 = vrsqrt.f32 %v80_v48  ;;  %vm108_vm3 = vweird.f32 %v302_v50  ;;  %vm89_vm5 = vmor %vm87_vm4, %vm88_vm2  ;;  %vm117_vm11 = vweird.f32 %v80_v48 }
  0xff   :  { %v83_v53 = vmul.f32 %v300_v47, %v82_v51  ;;  %305 = vrsqrt.f32 %v78_v49  ;;  %vm109_vm7 = vmor %vm107_vm6, %vm108_vm3  ;;  %vm97_vm13 = vweird.f32 %v78_v49 }
 0x100   :  { %v103_v54 = vmul.f32 %v302_v50, %v102_v52 }
 0x101   :  { %v84_v55 = vmul.f32 0.5, %v83_v53 }
 0x102   :  { %v104_v56 = vmul.f32 0.5, %v103_v54 }
 0x103   :  { %v85_v57 = vsub.f32 1.5, %v84_v55 }
 0x104   :  { %v304_v58 = vpop.eup %303  ;;  %v105_v59 = vsub.f32 1.5, %v104_v56 }
 0x105   :  { %v306_v60 = vpop.eup %305  ;;  %v86_v61 = vmul.f32 %v300_v47, %v85_v57  ;;  %v112_v62 = vmul.f32 %v304_v58, %v80_v48  ;;  %vm118_vm8 = vweird.f32 %v304_v58 }
 0x106   :  { %v106_v0 = vmul.f32 %v302_v50, %v105_v59  ;;  %v92_v1 = vmul.f32 %v306_v60, %v78_v49  ;;  %vm98_vm9 = vweird.f32 %v306_v60  ;;  %vm119_vm12 = vmor %vm117_vm11, %vm118_vm8 }
 0x107   :  { %v90_v2 = vsel %vm89_vm5, %v300_v47, %v86_v61  ;;  %v113_v3 = vmul.f32 %v304_v58, %v112_v62  ;;  %vm99_vm14 = vmor %vm97_vm13, %vm98_vm9 }
 0x108   :  { %v121_v5 = vmul.f32 %v90_v2, %v364_v20  ;;  %v110_v6 = vsel %vm109_vm7, %v302_v50, %v106_v0  ;;  %v93_v7 = vmul.f32 %v306_v60, %v92_v1 }
 0x109   :  { %v123_v8 = vmul.f32 %v110_v6, %v362_v19  ;;  %v114_v9 = vmul.f32 0.5, %v113_v3 }
 0x10a   :  { %v129_v10 = vmul.f32 %v294_v63, %v121_v5  ;;  %v94_v11 = vmul.f32 0.5, %v93_v7 }
 0x10b   :  { %v131_v12 = vmul.f32 %v294_v63, %v123_v8  ;;  %v115_v13 = vsub.f32 1.5, %v114_v9 }
 0x10c   :  { %v137_v14 = vadd.f32 %v295_v4, %v129_v10  ;;  %v95_v15 = vsub.f32 1.5, %v94_v11 }
 0x10d   :  { %v139_v16 = vadd.f32 %v295_v4, %v131_v12  ;;  %v116_v17 = vmul.f32 %v304_v58, %v115_v13 }
 0x10e   :  { %v141_v18 = vpack.c.bf16 %v137_v14, %v137_v14  ;;  %v96_v20 = vmul.f32 %v306_v60, %v95_v15 }
 0x10f   :  { %v143_v21 = vpack.c.bf16 %v139_v16, %v139_v16  ;;  %v120_v22 = vsel %vm119_vm12, %v304_v58, %v116_v17 }
 0x110   :  { %146 = vst.msk [vmem:[#allocation2] sm:$0xf] %vm145_vm10, %v141_v18  ;;  %v124_v19 = vmul.f32 %v120_v22, %v372_v29  ;;  %v100_v23 = vsel %vm99_vm14, %v306_v60, %v96_v20  ;;  %v296_v29 = vld [vmem:[%s416_s4] ss:$0 sm:$0xff] }
 0x111   :  { %148 = vst.msk [vmem:[#allocation2 + $0x8] sm:$0xf] %vm145_vm10, %v143_v21  ;;  %v122_v24 = vmul.f32 %v100_v23, %v374_v30 }
 0x112   :  { %v132_v25 = vmul.f32 %v294_v63, %v124_v19 }
 0x113   :  { %v130_v26 = vmul.f32 %v294_v63, %v122_v24 }
 0x114   :  { %v140_v27 = vadd.f32 %v295_v4, %v132_v25 }
 0x115   :  { %v138_v28 = vadd.f32 %v295_v4, %v130_v26 }
 0x116   :  { %v144_v31 = vpack.c.bf16 %v140_v27, %v140_v27 }
 0x117   :  { %v142_v32 = vpack.c.bf16 %v138_v28, %v138_v28 }
 0x118   :  { %149 = vst.msk [vmem:[#allocation2 + $0xc] sm:$0xf] %vm145_vm10, %v144_v31 }
 0x119   :  { %147 = vst.msk [vmem:[#allocation2 + $0x4] sm:$0xf] %vm145_vm10, %v142_v32 }
 0x11f   :  { %v277_v33 = vld [vmem:[#allocation2 + $0x8] sm:$0xff] }
 0x120   :  { %v276_v34 = vld [vmem:[#allocation2] sm:$0xff]  ;;  %275 = vmatmul.msk.bf16.vlgmr.msra.gmra.mxu1 %vm29_vm0, %v277_v33 }
 0x121   :  { %274 = vmatmul.msk.bf16.vlgmr.msra.gmra.mxu0 %vm29_vm0, %v276_v34 }
 0x19d   :  { %v205_v30 = vpop.f32.mrf.mxu1 }
 0x19e   :  { %v200_v35 = vpop.f32.mrf.mxu0  ;;  %v206_v36 = vadd.f32 %v296_v29, %v205_v30 }
 0x19f   :  { %v201_v37 = vadd.f32 %v296_v29, %v200_v35 }
 0x1a0   :  { %v212_v38 = vmul.f32 %v206_v36, %v206_v36 }
 0x1a1   :  { %v210_v39 = vmul.f32 %v201_v37, %v201_v37 }
 0x1a2   :  { %v216_v40 = vmul.f32 %v212_v38, %v206_v36 }
 0x1a3   :  { %v214_v41 = vmul.f32 %v210_v39, %v201_v37 }
 0x1a4   :  { %v220_v42 = vmul.f32 0.044715, %v216_v40 }
 0x1a5   :  { %v218_v43 = vmul.f32 0.044715, %v214_v41  ;;  %v207_v44 = vpop.f32.mrf.mxu1 }
 0x1a6   :  { %v224_v45 = vadd.f32 %v220_v42, %v206_v36  ;;  %v202_v46 = vpop.f32.mrf.mxu0  ;;  %v208_v47 = vadd.f32 %v296_v29, %v207_v44 }
 0x1a7   :  { %v222_v48 = vadd.f32 %v218_v43, %v201_v37  ;;  %v203_v49 = vadd.f32 %v296_v29, %v202_v46 }
 0x1a8   :  { %v228_v50 = vmul.f32 0.7978846, %v224_v45  ;;  %v213_v51 = vmul.f32 %v208_v47, %v208_v47 }
 0x1a9   :  { %v226_v52 = vmul.f32 0.7978846, %v222_v48  ;;  %v211_v53 = vmul.f32 %v203_v49, %v203_v49 }
 0x1aa   :  { %v217_v54 = vmul.f32 %v213_v51, %v208_v47  ;;  %307 = vtanh.f32 %v228_v50 }
 0x1ab   :  { %v215_v55 = vmul.f32 %v211_v53, %v203_v49  ;;  %309 = vtanh.f32 %v226_v52 }
 0x1ac   :  { %v221_v56 = vmul.f32 0.044715, %v217_v54 }
 0x1ad   :  { %v219_v57 = vmul.f32 0.044715, %v215_v55 }
 0x1ae   :  { %v225_v58 = vadd.f32 %v221_v56, %v208_v47 }
 0x1af   :  { %v223_v59 = vadd.f32 %v219_v57, %v203_v49 }
 0x1b0   :  { %v229_v60 = vmul.f32 0.7978846, %v225_v58  ;;  %v308_v62 = vpop.eup %307 }
 0x1b1   :  { %v227_v61 = vmul.f32 0.7978846, %v223_v59  ;;  %v310_v63 = vpop.eup %309  ;;  %v236_v0 = vadd.f32 1.0, %v308_v62 }
 0x1b2   :  { %311 = vtanh.f32 %v229_v60  ;;  %v234_v1 = vadd.f32 1.0, %v310_v63 }
 0x1b3   :  { %313 = vtanh.f32 %v227_v61  ;;  %v240_v4 = vmul.f32 0.5, %v236_v0 }
 0x1b4   :  { %v238_v6 = vmul.f32 0.5, %v234_v1 }
 0x1b5   :  { %v244_v10 = vmul.f32 %v240_v4, %v206_v36 }
 0x1b6   :  { %v242_v12 = vmul.f32 %v238_v6, %v201_v37 }
 0x1b8   :  { %v312_v2 = vpop.eup %311 }
 0x1b9   :  { %v314_v3 = vpop.eup %313  ;;  %v237_v5 = vadd.f32 1.0, %v312_v2 }
 0x1ba   :  { %v235_v7 = vadd.f32 1.0, %v314_v3 }
 0x1bb   :  { %v241_v8 = vmul.f32 0.5, %v237_v5 }
 0x1bc   :  { %v239_v9 = vmul.f32 0.5, %v235_v7 }
 0x1bd   :  { %v245_v11 = vmul.f32 %v241_v8, %v208_v47 }
 0x1be   :  { %v243_v13 = vmul.f32 %v239_v9, %v203_v49 }
 0x1bf   :  { %v288_v14 = vpack.c.bf16 %v245_v11, %v244_v10 }
 0x1c0   :  { %v283_v15 = vpack.c.bf16 %v243_v13, %v242_v12 }
 0x1c1   :  { %290 = vst [vmem:[%s418_s5 + $0x8] sm:$0xff] %v288_v14  }
 0x1c2   :  { %284 = vst [vmem:[%s418_s5] sm:$0xff] %v283_v15  }

// kernel: forward.16
= control target key start
LH: loop header
LB: loop body
LE: loop exit
PB: predicated region body
PF: predicated region fallthrough
CT: control target
= control target key end

     0   :  { %s1191_s17 = smov 0   ;;  %s1193_s18 = smov 0   ;;  %s1341_s0 = inlined_call_operand.vmem [shape: f32[2,16,32], index: 0, kind: input, shape index: {}]   ;;  %s1342_s1 = inlined_call_operand.vmem [shape: f32[1,32], index: 1, kind: input, shape index: {}]   ;;  %s1343_s2 = inlined_call_operand.vmem [shape: f32[1,32], index: 2, kind: input, shape index: {}]   ;;  %s1344_s3 = inlined_call_operand.vmem [shape: bf16[2,32,16], index: 3, kind: input, shape index: {}]   ;;  %s1345_s4 = inlined_call_operand.vmem [shape: bf16[2,32,16], index: 4, kind: input, shape index: {}]   ;;  %s1346_s5 = inlined_call_operand.vmem [shape: bf16[2,32,16], index: 5, kind: input, shape index: {}]   ;;  %s1347_s6 = inlined_call_operand.vmem [shape: f32[2,1,16], index: 6, kind: input, shape index: {}]   ;;  %s1348_s7 = inlined_call_operand.vmem [shape: f32[2,1,16], index: 7, kind: input, shape index: {}]   ;;  %s1349_s8 = inlined_call_operand.vmem [shape: f32[2,1,16], index: 8, kind: input, shape index: {}]   ;;  %s1350_s9 = inlined_call_operand.vmem [shape: bf16[2,16,32], index: 9, kind: input, shape index: {}]   ;;  %s1351_s10 = inlined_call_operand.vmem [shape: f32[1,32], index: 10, kind: input, shape index: {}]   ;;  %s1352_s11 = inlined_call_operand.vmem [shape: f32[2,16,32], index: 11, kind: output, shape index: {}]  }
   0x1   :  { %1357 = sst [smem:[#allocation9_spill]] %s1341_s0  ;;  %s1195_s19 = smov 0  }
   0x2   :  { %1358 = sst [smem:[#allocation10_spill]] %s1344_s3  ;;  %s1197_s20 = smov 0  }
   0x3   :  { %1359 = sst [smem:[#allocation11_spill]] %s1345_s4  ;;  %s1199_s21 = smov 0  }
   0x4 LB: > { %1360 = sst [smem:[#allocation3_spill]] %s1120_s19  ;;  %s30_s22 = sadd.s32 1, %s1120_s19  ;;  %s1128_s21 = sphi %s1199_s21, %s21_s21   ;;  %s1124_s20 = sphi %s1197_s20, %s1374_s20   ;;  %s1120_s19 = sphi %s1195_s19, %s1373_s19   ;;  %s1116_s18 = sphi %s1193_s18, %s1372_s18   ;;  %s1112_s17 = sphi %s1191_s17, %s1371_s17  }
   0x5   : > { %1361 = sst [smem:[#allocation4_spill]] %s1124_s20  ;;  %s33_s23 = sadd.s32 1, %s1124_s20 }
   0x6   : > { %1362 = sst [smem:[#allocation5_spill]] %s1128_s21  ;;  %p31_p0 = scmp.ge.s32.totalorder %s30_s22, 2 }
   0x7   : > { %p961_p1 = scmp.ge.s32.totalorder %s1128_s21, 1  ;;  %p413_p2 = scmp.lt.s32.totalorder %s1128_s21, 5 }
   0x8   : > { %s1376_s22 = smov (%p31_p0, %s30_s22), 0  ;;  %s1378_s23 = smov (!%p31_p0, %s33_s23), %s1124_s20 }
   0x9   : > { %1363 = sst [smem:[#allocation6_spill]] %s1376_s22  ;;  %p414_p3 = pnand %p961_p1, %p413_p2 }
   0xa   : > { %p35_p4 = scmp.ge.s32.totalorder %s1378_s23, 2 }
   0xb   : > { %417 = sbr.rel (%p414_p3) target bundleno = 1015 (0x3f7), region = 64 }
   0xc   : > { %s1380_s23 = smov (%p35_p4, %s1378_s23), 0 }
   0xd   : > { %1364 = sst [smem:[#allocation7_spill]] %s1380_s23 }
  0x10   : > { %p482_p5 = scmp.lt.s32.totalorder %s1116_s18, 1  ;;  %p487_p6 = scmp.lt.s32.totalorder %s1112_s17, 1 }
  0x11   : > { %s1365_s0 = sld [smem:[#allocation9_spill]]  ;;  %p974_p7 = scmp.ne.s32.totalorder %s1112_s17, 0 }
  0x12   : > { %s1382_s18 = smov (!%p482_p5, %s1116_s18), 1  ;;  %s1366_s3 = sld [smem:[#allocation10_spill]] }
  0x13   : > { %s1225_s24 = scalar_select %p487_p6, %s1112_s17, 1 }
  0x14   : > { %s1015_s25 = sshll.u32 %s1382_s18, 4  ;;  %s1367_s4 = sld [smem:[#allocation11_spill]] }
  0x15   : > { %s1016_s29 = sshll.u32 %s1225_s24, 4  ;;  %s504_s26 = scalar_lea.vmem %s1347_s6, %s1225_s24 }
  0x16   : > { %s1244_s20 = scalar_lea.vmem %s1346_s5, %s1016_s29  ;;  %s507_s30 = scalar_lea.vmem %s1348_s7, %s1225_s24 }
  0x17   : > { %s486_s28 = scalar_lea.vmem %s1365_s0, %s1015_s25  ;;  %s510_s21 = scalar_lea.vmem %s1349_s8, %s1225_s24 }
  0x18   : > { %s1234_s13 = scalar_lea.vmem %s1366_s3, %s1016_s29  ;;  %s1019_s14 = sshll.u32 %s1225_s24, 3 }
  0x19   : > { %525 = sbr.rel (%p974_p7) target bundleno = 310 (0x136), region = 68 }
  0x1a   : > { %s1239_s16 = scalar_lea.vmem %s1367_s4, %s1016_s29  ;;  %s1267_s29 = scalar_lea.vmem %s1350_s9, %s1019_s14 }
  0x1b   : > { %1368 = sst [smem:[#allocation8_spill]] %s1239_s16  ;;  %s1262_s16 = scalar_lea.vmem %s1352_s11, %s1015_s25 }
  0x1e   : > { %v526_v0 = vld [vmem:[%s486_s28] sm:$0xff]  ;;  %vm528_vm0 = vcmask 261120   ;;  %v527_v3 = vld [vmem:[%s486_s28 + $0x8] sm:$0xff]  ;;  %v1130_v7 = vmov 32.0   ;;  %vm594_vm6 = vcmask 257024  }
  0x1f   : > { %v1070_v1 = vld [vmem:[%s1351_s10] ss:$0 sm:$0xff]  ;;  %v529_v2 = vsel %vm528_vm0, %v526_v0, 0.0  ;;  %v532_v6 = vsel %vm528_vm0, %v527_v3, 0.0  ;;  %1073 = vrcp.f32 %v1130_v7 }
  0x20   : > { %v601_v4 = vadd.f32 %v1070_v1, %v526_v0  ;;  %530 = vadd.xlane.f32.xlu0 %v529_v2  ;;  %v602_v5 = vadd.f32 %v1070_v1, %v527_v3  ;;  %v1071_v38 = vld [vmem:[%s1342_s1] ss:$0 sm:$0xff] }
  0x21   : > { %v1072_v41 = vld [vmem:[%s1343_s2] ss:$0 sm:$0xff] }
  0x22   : > { %603 = vst.msk [vmem:[%s1262_s16] sm:$0xff] %vm528_vm0, %v601_v4 }
  0x23   : > { %604 = vst.msk [vmem:[%s1262_s16 + $0x8] sm:$0xff] %vm528_vm0, %v602_v5 }
  0x25   : > { %v1074_v8 = vpop.eup %1073 }
  0x26   : > { %v536_v9 = vmul.f32 32.0, %v1074_v8  ;;  %vm540_vm1 = vweird.f32 %v1074_v8 }
  0x28   : > { %533 = vadd.xlane.f32.xlu0 %v532_v6  ;;  %v537_v10 = vsub.f32 1.0, %v536_v9 }
  0x2a   : > { %v538_v11 = vmul.f32 %v1074_v8, %v537_v10 }
  0x2c   : > { %v539_v12 = vadd.f32 %v1074_v8, %v538_v11 }
  0x2e   : > { %v541_v13 = vsel %vm540_vm1, %v1074_v8, %v539_v12 }
  0x93   : > { %v531_v14 = vpop.xlane.xlu0 %530 }
  0x94   : > { %v542_v15 = vmul.f32 %v541_v13, %v531_v14 }
  0x96   : > { %v544_v16 = vsub.f32 %v526_v0, %v542_v15 }
  0x98   : > { %v546_v17 = vmul.f32 %v544_v16, %v544_v16 }
  0x9a   : > { %v548_v18 = vsel %vm528_vm0, %v546_v17, 0.0 }
  0x9b   : > { %549 = vadd.xlane.f32.xlu1 %v548_v18  ;;  %v534_v19 = vpop.xlane.xlu0 %533 }
  0x9c   : > { %v543_v20 = vmul.f32 %v541_v13, %v534_v19 }
  0x9e   : > { %v545_v21 = vsub.f32 %v527_v3, %v543_v20 }
  0xa0   : > { %v547_v22 = vmul.f32 %v545_v21, %v545_v21 }
  0xa2   : > { %v551_v23 = vsel %vm528_vm0, %v547_v22, 0.0 }
  0xa3   : > { %552 = vadd.xlane.f32.xlu1 %v551_v23 }
 0x10e   : > { %v550_v24 = vpop.xlane.xlu1 %549 }
 0x10f   : > { %v554_v25 = vmul.f32 %v550_v24, %v541_v13 }
 0x111   : > { %v556_v26 = vadd.f32 1e-05, %v554_v25 }
 0x113   : > { %1075 = vrsqrt.f32 %v556_v26  ;;  %vm564_vm3 = vweird.f32 %v556_v26 }
 0x116   : > { %v553_v27 = vpop.xlane.xlu1 %552 }
 0x117   : > { %v555_v28 = vmul.f32 %v553_v27, %v541_v13 }
 0x119   : > { %v1076_v29 = vpop.eup %1075  ;;  %v557_v30 = vadd.f32 1e-05, %v555_v28 }
 0x11a   : > { %v559_v31 = vmul.f32 %v1076_v29, %v556_v26  ;;  %vm565_vm2 = vweird.f32 %v1076_v29 }
 0x11b   : > { %1077 = vrsqrt.f32 %v557_v30  ;;  %vm566_vm4 = vmor %vm564_vm3, %vm565_vm2  ;;  %vm574_vm7 = vweird.f32 %v557_v30 }
 0x11c   : > { %v560_v32 = vmul.f32 %v1076_v29, %v559_v31 }
 0x11e   : > { %v561_v33 = vmul.f32 0.5, %v560_v32 }
 0x120   : > { %v562_v34 = vsub.f32 1.5, %v561_v33 }
 0x121   : > { %v1078_v35 = vpop.eup %1077 }
 0x122   : > { %v563_v36 = vmul.f32 %v1076_v29, %v562_v34  ;;  %v569_v37 = vmul.f32 %v1078_v35, %v557_v30  ;;  %vm575_vm5 = vweird.f32 %v1078_v35 }
 0x123   : > { %vm576_vm8 = vmor %vm574_vm7, %vm575_vm5 }
 0x124   : > { %v567_v39 = vsel %vm566_vm4, %v1076_v29, %v563_v36  ;;  %v570_v40 = vmul.f32 %v1078_v35, %v569_v37 }
 0x125   : > { %v578_v42 = vmul.f32 %v567_v39, %v544_v16 }
 0x126   : > { %v571_v43 = vmul.f32 0.5, %v570_v40 }
 0x127   : > { %v584_v44 = vmul.f32 %v1071_v38, %v578_v42 }
 0x128   : > { %v572_v45 = vsub.f32 1.5, %v571_v43 }
 0x129   : > { %v590_v46 = vadd.f32 %v1072_v41, %v584_v44 }
 0x12a   : > { %v573_v47 = vmul.f32 %v1078_v35, %v572_v45 }
 0x12b   : > { %v592_v48 = vpack.c.bf16 %v590_v46, %v590_v46 }
 0x12c   : > { %v577_v49 = vsel %vm576_vm8, %v1078_v35, %v573_v47 }
 0x12d   : > { %595 = vst.msk [vmem:[#allocation2] sm:$0xf] %vm594_vm6, %v592_v48  ;;  %v579_v50 = vmul.f32 %v577_v49, %v545_v21 }
 0x12f   : > { %v585_v51 = vmul.f32 %v1071_v38, %v579_v50 }
 0x131   : > { %v591_v52 = vadd.f32 %v1072_v41, %v585_v51 }
 0x133   : > { %v593_v53 = vpack.c.bf16 %v591_v52, %v591_v52 }
 0x135   : > { %596 = vst.msk [vmem:[#allocation2 + $0x4] sm:$0xf] %vm594_vm6, %v593_v53 }
 0x136 PF: > { %s1369_s28 = sld [smem:[#allocation8_spill]]  ;;  %v1023_v54 = vld [vmem:[%s1234_s13 + $0x8] sm:$0xff]  ;;  %v1022_v56 = vld [vmem:[%s1234_s13] sm:$0xff]  ;;  %vm632_vm9 = vcmask 261120   ;;  %vm722_vm10 = vcmask 130048  }
 0x137   : > { %642 = vmatpush.bf16.msra.mxu0 %v1023_v54  ;;  %v1027_v59 = vld [vmem:[%s1244_s20 + $0x8] sm:$0xff]  ;;  %v1026_v60 = vld [vmem:[%s1244_s20] sm:$0xff] }
 0x138   : > { %712 = vmatpush.bf16.msra.mxu2 %v1027_v59  ;;  %v1080_v63 = vld [vmem:[%s507_s30] ss:$0 sm:$0xff]  ;;  %v785_v46 = vld [vmem:[%s1262_s16 + $0x8] sm:$0xff] }
 0x139   : > { %v1079_v2 = vld [vmem:[%s504_s26] ss:$0 sm:$0xff] }
 0x13a   : > { %v1081_v13 = vld [vmem:[%s510_s21] ss:$0 sm:$0xff] }
 0x13b   : > { %643 = vmatpush.bf16.msra.mxu0 %v1022_v56  ;;  %v1028_v33 = vld [vmem:[%s1267_s29] sm:$0xff] }
 0x13c   : > { %v1025_v55 = vld [vmem:[%s1369_s28 + $0x8] sm:$0xff]  ;;  %v1024_v57 = vld [vmem:[%s1369_s28] sm:$0xff]  ;;  %713 = vmatpush.bf16.msra.mxu2 %v1026_v60 }
 0x13d   : > { %678 = vmatpush.bf16.msra.mxu1 %v1025_v55  ;;  %v1021_v58 = vld [vmem:[#allocation2] sm:$0xff] }
 0x13e   : > { %987 = vmatmul.msk.bf16.vlgmr.msra.gmra.mxu0 %vm632_vm9, %v1021_v58  ;;  %v784_v43 = vld [vmem:[%s1262_s16] sm:$0xff] }
 0x13f   : > { %1005 = vmatmul.msk.bf16.vlgmr.msra.gmra.mxu2 %vm632_vm9, %v1021_v58 }
 0x141   : > { %679 = vmatpush.bf16.msra.mxu1 %v1024_v57 }
 0x144   : > { %996 = vmatmul.msk.bf16.vlgmr.msra.gmra.mxu1 %vm632_vm9, %v1021_v58 }
 0x145   : > { %805 = vmatpush.bf16.msrb.mxu1 %v1028_v33 }
 0x1bb   : > { %v645_v61 = vpop.f32.mrf.mxu0 }
 0x1bc   : > { %v646_v7 = vadd.f32 %v1079_v2, %v645_v61 }
 0x1be   : > { %v650_v10 = vmul.f32 0.25, %v646_v7 }
 0x1c1   : > { %v681_v62 = vpop.f32.mrf.mxu1 }
 0x1c2   : > { %v682_v3 = vadd.f32 %v1080_v63, %v681_v62  ;;  %v715_v12 = vpop.f32.mrf.mxu2 }
 0x1c3   : > { %v647_v0 = vpop.f32.mrf.mxu0  ;;  %v716_v14 = vadd.f32 %v1081_v13, %v715_v12 }
 0x1c4   : > { %v648_v5 = vadd.f32 %v1079_v2, %v647_v0 }
 0x1c6   : > { %v651_v9 = vmul.f32 0.25, %v648_v5 }
 0x1c8   : > { %v720_v11 = vpack.c.bf16 %v651_v9, %v650_v10 }
 0x1c9   : > { %v683_v1 = vpop.f32.mrf.mxu1 }
 0x1ca   : > { %v684_v4 = vadd.f32 %v1080_v63, %v683_v1  ;;  %v717_v15 = vpop.f32.mrf.mxu2 }
 0x1cb   : > { %v718_v16 = vadd.f32 %v1081_v13, %v717_v15 }
 0x1cc   : > { %v721_v6 = vpack.c.bf16 %v684_v4, %v682_v3 }
 0x1cd   : > { %v762_v17 = vpack.c.bf16 %v718_v16, %v716_v14 }
 0x1ce   : > { %v727_v8 = vsel %vm722_vm10, %v721_v6, 0 }
 0x1cf   : > { %736 = vmatpush.bf16.xpose.msra.mxu3 %v727_v8  ;;  %773 = vmatpush.bf16.msrb.mxu0 %v762_v17 }
 0x1d6   : > { %1006 = vmatmul.msk.bf16.vlgmr.msra.gmra.mxu3 %vm722_vm10, %v720_v11 }
 0x259   : > { %v738_v18 = vpop.f32.mrf.mxu3 }
 0x25a   : > { %v743_v19 = vsel %vm722_vm10, %v738_v18, -inf }
 0x25b   : > { %744 = vmax.xlane.f32.xlu0 %v743_v19 }
 0x261   : > { %v740_v20 = vpop.f32.mrf.mxu3 }
 0x262   : > { %v746_v21 = vsel %vm722_vm10, %v740_v20, -inf }
 0x263   : > { %747 = vmax.xlane.f32.xlu0 %v746_v21 }
 0x2ce   : > { %v745_v22 = vpop.xlane.xlu0 %744 }
 0x2cf   : > { %v749_v23 = vsub.f32 %v738_v18, %v745_v22 }
 0x2d1   : > { %v751_v24 = vmul.f32 1.442695, %v749_v23 }
 0x2d3   : > { %1082 = vpow2.f32 %v751_v24 }
 0x2d6   : > { %v748_v25 = vpop.xlane.xlu0 %747 }
 0x2d7   : > { %v750_v26 = vsub.f32 %v740_v20, %v748_v25 }
 0x2d9   : > { %v1083_v27 = vpop.eup %1082  ;;  %v753_v28 = vmul.f32 1.442695, %v750_v26 }
 0x2da   : > { %v755_v29 = vsel %vm722_vm10, %v1083_v27, 0.0 }
 0x2db   : > { %1084 = vpow2.f32 %v753_v28  ;;  %756 = vadd.xlane.f32.xlu1 %v755_v29 }
 0x2e1   : > { %v1085_v30 = vpop.eup %1084 }
 0x2e2   : > { %v758_v31 = vsel %vm722_vm10, %v1085_v30, 0.0  ;;  %v761_v32 = vpack.c.bf16 %v1085_v30, %v1083_v27 }
 0x2e3   : > { %759 = vadd.xlane.f32.xlu1 %v758_v31 }
 0x2e4   : > { %1007 = vmatmul.msk.bf16.vlgmr.msrb.gmra.mxu0 %vm722_vm10, %v761_v32 }
 0x34e   : > { %v757_v34 = vpop.xlane.xlu1 %756 }
 0x34f   : > { %1086 = vrcp.f32 %v757_v34 }
 0x355   : > { %v1087_v37 = vpop.eup %1086 }
 0x356   : > { %v760_v35 = vpop.xlane.xlu1 %759 }
 0x357   : > { %1088 = vrcp.f32 %v760_v35 }
 0x35d   : > { %v1089_v38 = vpop.eup %1088 }
 0x361   : > { %v775_v36 = vpop.f32.mrf.mxu0 }
 0x362   : > { %v782_v40 = vmul.f32 %v1087_v37, %v775_v36 }
 0x369   : > { %v777_v39 = vpop.f32.mrf.mxu0 }
 0x36a   : > { %v783_v41 = vmul.f32 %v1089_v38, %v777_v39 }
 0x36c   : > { %v786_v42 = vpack.c.bf16 %v783_v41, %v782_v40 }
 0x36e   : > { %1012 = vmatmul.msk.bf16.vlgmr.msrb.gmra.mxu1 %vm722_vm10, %v786_v42 }
 0x3eb   : > { %v807_v44 = vpop.f32.mrf.mxu1 }
 0x3ec   : > { %v812_v45 = vadd.f32 %v807_v44, %v784_v43 }
 0x3ee   : > { %814 = vst.msk [vmem:[%s1262_s16] sm:$0xff] %vm632_vm9, %v812_v45 }
 0x3f3   : > { %v809_v47 = vpop.f32.mrf.mxu1 }
 0x3f4   : > { %v813_v48 = vadd.f32 %v809_v47, %v785_v46 }
 0x3f6   : > { %815 = vst.msk [vmem:[%s1262_s16 + $0x8] sm:$0xff] %vm632_vm9, %v813_v48 }
 0x3f7 PF: > { %s1370_s21 = sld [smem:[#allocation5_spill]] }
 0x3f8   : > { %s1371_s17 = sld [smem:[#allocation3_spill]] }
 0x3f9   : > { %s1372_s18 = sld [smem:[#allocation4_spill]] }
 0x3fa   : > { %s1373_s19 = sld [smem:[#allocation6_spill]] }
 0x3fb   : > { %s1374_s20 = sld [smem:[#allocation7_spill]] }
 0x3fd   : > { %s21_s21 = sadd.s32 1, %s1370_s21  }
 0x3fe   : > { %p18_p8 = scmp.ge.s32.totalorder %s21_s21, 6  }
 0x400   :  { %20 = sbr.rel (!%p18_p8) target bundleno = 4 (0x4), region = 119 }

// kernel: forward.18
= control target key start
LH: loop header
LB: loop body
LE: loop exit
PB: predicated region body
PF: predicated region fallthrough
CT: control target
= control target key end

     0   :  { %vm128_vm0 = vcmask 261120   ;;  %s278_s1 = inlined_call_operand.vmem [shape: bf16[128,32], index: 1, kind: input, shape index: {}]   ;;  %s279_s2 = inlined_call_operand.vmem [shape: f32[1,32], index: 2, kind: input, shape index: {}]   ;;  %s280_s0 = inlined_call_operand.vmem [shape: bf16[32,128], index: 0, kind: input, shape index: {}]   ;;  %s281_s3 = inlined_call_operand.vmem [shape: f32[32,32], index: 3, kind: input, shape index: {}]   ;;  %s282_s4 = inlined_call_operand.vmem [shape: f32[32,32], index: 4, kind: output, shape index: {}]  }
   0x1   :  { %v186_v0 = vld [vmem:[%s278_s1 + $0x38] sm:$0xff]  ;;  %v185_v1 = vld [vmem:[%s278_s1 + $0x30] sm:$0xff]  ;;  %v184_v2 = vld [vmem:[%s278_s1 + $0x28] sm:$0xff] }
   0x2   :  { %101 = vmatpush.bf16.msra.mxu0 %v186_v0  ;;  %187 = vmatpush.bf16.msra.mxu1 %v186_v0  ;;  %v183_v3 = vld [vmem:[%s278_s1 + $0x20] sm:$0xff]  ;;  %v182_v4 = vld [vmem:[%s278_s1 + $0x18] sm:$0xff]  ;;  %v181_v5 = vld [vmem:[%s278_s1 + $0x10] sm:$0xff] }
   0x3   :  { %v180_v6 = vld [vmem:[%s278_s1 + $0x8] sm:$0xff]  ;;  %v179_v7 = vld [vmem:[%s278_s1] sm:$0xff]  ;;  %v122_v14 = vld [vmem:[%s281_s3 + $0x10] sm:$0xff] }
   0x4   :  { %v177_v8 = vld [vmem:[%s280_s0] sm:$0xff]  ;;  %v178_v9 = vld [vmem:[%s280_s0 + $0x8] sm:$0xff]  ;;  %v123_v22 = vld [vmem:[%s281_s3 + $0x18] sm:$0xff] }
   0x5   :  { %v195_v10 = vld [vmem:[%s279_s2] ss:$0 sm:$0xff]  ;;  %v121_v20 = vld [vmem:[%s281_s3 + $0x8] sm:$0xff] }
   0x6   :  { %102 = vmatpush.bf16.msra.mxu0 %v185_v1  ;;  %188 = vmatpush.bf16.msra.mxu1 %v185_v1  ;;  %v120_v12 = vld [vmem:[%s281_s3] sm:$0xff] }
   0xa   :  { %103 = vmatpush.bf16.msra.mxu0 %v184_v2  ;;  %189 = vmatpush.bf16.msra.mxu1 %v184_v2 }
   0xe   :  { %104 = vmatpush.bf16.msra.mxu0 %v183_v3  ;;  %190 = vmatpush.bf16.msra.mxu1 %v183_v3 }
  0x12   :  { %105 = vmatpush.bf16.msra.mxu0 %v182_v4  ;;  %191 = vmatpush.bf16.msra.mxu1 %v182_v4 }
  0x16   :  { %106 = vmatpush.bf16.msra.mxu0 %v181_v5  ;;  %192 = vmatpush.bf16.msra.mxu1 %v181_v5 }
  0x1a   :  { %107 = vmatpush.bf16.msra.mxu0 %v180_v6  ;;  %193 = vmatpush.bf16.msra.mxu1 %v180_v6 }
  0x1e   :  { %108 = vmatpush.bf16.msra.mxu0 %v179_v7  ;;  %194 = vmatpush.bf16.msra.mxu1 %v179_v7 }
  0x21   :  { %109 = vmatmul.bf16.vlgmr.msra.gmra.mxu0 %v177_v8  ;;  %114 = vmatmul.bf16.vlgmr.msra.gmra.mxu1 %v178_v9 }
  0x9e   :  { %v110_v11 = vpop.f32.mrf.mxu0  ;;  %v115_v13 = vpop.f32.mrf.mxu1 }
  0x9f   :  { %v111_v15 = vadd.f32 %v195_v10, %v110_v11  ;;  %v116_v16 = vadd.f32 %v195_v10, %v115_v13 }
  0xa1   :  { %v124_v17 = vadd.f32 %v120_v12, %v111_v15  ;;  %v126_v18 = vadd.f32 %v122_v14, %v116_v16 }
  0xa3   :  { %129 = vst.msk [vmem:[%s282_s4] sm:$0xff] %vm128_vm0, %v124_v17 }
  0xa4   :  { %131 = vst.msk [vmem:[%s282_s4 + $0x10] sm:$0xff] %vm128_vm0, %v126_v18 }
  0xa6   :  { %v112_v19 = vpop.f32.mrf.mxu0  ;;  %v117_v21 = vpop.f32.mrf.mxu1 }
  0xa7   :  { %v113_v23 = vadd.f32 %v195_v10, %v112_v19  ;;  %v118_v24 = vadd.f32 %v195_v10, %v117_v21 }
  0xa9   :  { %v125_v25 = vadd.f32 %v121_v20, %v113_v23  ;;  %v127_v26 = vadd.f32 %v123_v22, %v118_v24 }
  0xab   :  { %130 = vst.msk [vmem:[%s282_s4 + $0x8] sm:$0xff] %vm128_vm0, %v125_v25 }
  0xac   :  { %132 = vst.msk [vmem:[%s282_s4 + $0x18] sm:$0xff] %vm128_vm0, %v127_v26 }

// kernel: forward.29
= control target key start
LH: loop header
LB: loop body
LE: loop exit
PB: predicated region body
PF: predicated region fallthrough
CT: control target
= control target key end

     0   :  { %vm29_vm0 = vcmask 261120   ;;  %v269_v8 = vmov 32.0   ;;  %vm145_vm10 = vcmask 257024   ;;  %vm218_vm15 = vcmask 392192   ;;  %s373_s0 = inlined_call_operand.vmem [shape: f32[32,32], index: 0, kind: input, shape index: {}]   ;;  %s374_s1 = inlined_call_operand.vmem [shape: f32[1,32], index: 1, kind: input, shape index: {}]   ;;  %s375_s2 = inlined_call_operand.vmem [shape: f32[1,32], index: 2, kind: input, shape index: {}]   ;;  %s376_s4 = inlined_call_operand.vmem [shape: f32[1,48], index: 4, kind: input, shape index: {}]   ;;  %s377_s3 = inlined_call_operand.vmem [shape: bf16[32,48], index: 3, kind: input, shape index: {}]   ;;  %s378_s5 = inlined_call_operand.vmem [shape: f32[32,48], index: 5, kind: output, shape index: {}]  }
   0x1   :  { %v27_v0 = vld [vmem:[%s373_s0 + $0x10] sm:$0xff]  ;;  %v25_v1 = vld [vmem:[%s373_s0] sm:$0xff]  ;;  %v28_v4 = vld [vmem:[%s373_s0 + $0x18] sm:$0xff]  ;;  %259 = vrcp.f32 %v269_v8 }
   0x2   :  { %v36_v2 = vsel %vm29_vm0, %v27_v0, 0.0  ;;  %v30_v3 = vsel %vm29_vm0, %v25_v1, 0.0  ;;  %v26_v5 = vld [vmem:[%s373_s0 + $0x8] sm:$0xff]  ;;  %v39_v6 = vsel %vm29_vm0, %v28_v4, 0.0  ;;  %v251_v46 = vld [vmem:[%s377_s3] sm:$0xff] }
   0x3   :  { %37 = vadd.xlane.f32.xlu1 %v36_v2  ;;  %31 = vadd.xlane.f32.xlu0 %v30_v3  ;;  %v33_v7 = vsel %vm29_vm0, %v26_v5, 0.0  ;;  %v252_v43 = vld [vmem:[%s377_s3 + $0x8] sm:$0xff]  ;;  %v256_v63 = vld [vmem:[%s374_s1] ss:$0 sm:$0xff] }
   0x4   :  { %197 = vmatpush.bf16.msra.mxu0 %v252_v43  ;;  %253 = vmatpush.bf16.msra.mxu1 %v252_v43 }
   0x7   :  { %v260_v9 = vpop.eup %259 }
   0x8   :  { %v43_v10 = vmul.f32 32.0, %v260_v9  ;;  %vm47_vm1 = vweird.f32 %v260_v9  ;;  %198 = vmatpush.bf16.msra.mxu0 %v251_v46  ;;  %254 = vmatpush.bf16.msra.mxu1 %v251_v46 }
   0xa   :  { %v44_v11 = vsub.f32 1.0, %v43_v10 }
   0xb   :  { %40 = vadd.xlane.f32.xlu1 %v39_v6  ;;  %34 = vadd.xlane.f32.xlu0 %v33_v7 }
   0xc   :  { %v45_v12 = vmul.f32 %v260_v9, %v44_v11 }
   0xe   :  { %v46_v13 = vadd.f32 %v260_v9, %v45_v12 }
  0x10   :  { %v48_v14 = vsel %vm47_vm1, %v260_v9, %v46_v13 }
  0x76   :  { %v38_v15 = vpop.xlane.xlu1 %37  ;;  %v32_v16 = vpop.xlane.xlu0 %31 }
  0x77   :  { %v51_v17 = vmul.f32 %v48_v14, %v38_v15  ;;  %v49_v18 = vmul.f32 %v48_v14, %v32_v16 }
  0x79   :  { %v316_v19 = vsub.f32 %v27_v0, %v51_v17  ;;  %v318_v20 = vsub.f32 %v25_v1, %v49_v18 }
  0x7b   :  { %v59_v21 = vmul.f32 %v316_v19, %v316_v19  ;;  %v57_v22 = vmul.f32 %v318_v20, %v318_v20 }
  0x7d   :  { %v67_v23 = vsel %vm29_vm0, %v59_v21, 0.0  ;;  %v61_v24 = vsel %vm29_vm0, %v57_v22, 0.0 }
  0x7e   :  { %v41_v25 = vpop.xlane.xlu1 %40  ;;  %68 = vadd.xlane.f32.xlu0 %v67_v23  ;;  %62 = vadd.xlane.f32.xlu2 %v61_v24  ;;  %v35_v26 = vpop.xlane.xlu0 %34 }
  0x7f   :  { %v52_v27 = vmul.f32 %v48_v14, %v41_v25  ;;  %v50_v28 = vmul.f32 %v48_v14, %v35_v26 }
  0x81   :  { %v326_v29 = vsub.f32 %v28_v4, %v52_v27  ;;  %v328_v30 = vsub.f32 %v26_v5, %v50_v28  ;;  %v257_v4 = vld [vmem:[%s375_s2] ss:$0 sm:$0xff] }
  0x83   :  { %v60_v31 = vmul.f32 %v326_v29, %v326_v29  ;;  %v58_v32 = vmul.f32 %v328_v30, %v328_v30 }
  0x85   :  { %v70_v33 = vsel %vm29_vm0, %v60_v31, 0.0  ;;  %v64_v34 = vsel %vm29_vm0, %v58_v32, 0.0 }
  0x86   :  { %71 = vadd.xlane.f32.xlu1 %v70_v33  ;;  %65 = vadd.xlane.f32.xlu2 %v64_v34 }
  0xf1   :  { %v63_v35 = vpop.xlane.xlu2 %62  ;;  %v69_v36 = vpop.xlane.xlu0 %68 }
  0xf2   :  { %v73_v37 = vmul.f32 %v63_v35, %v48_v14  ;;  %v75_v38 = vmul.f32 %v69_v36, %v48_v14 }
  0xf4   :  { %v77_v39 = vadd.f32 1e-05, %v73_v37  ;;  %v79_v40 = vadd.f32 1e-05, %v75_v38 }
  0xf6   :  { %261 = vrsqrt.f32 %v77_v39  ;;  %vm87_vm4 = vweird.f32 %v77_v39  ;;  %vm107_vm6 = vweird.f32 %v79_v40 }
  0xf7   :  { %263 = vrsqrt.f32 %v79_v40 }
  0xf9   :  { %v72_v41 = vpop.xlane.xlu1 %71  ;;  %v66_v42 = vpop.xlane.xlu2 %65 }
  0xfa   :  { %v76_v44 = vmul.f32 %v72_v41, %v48_v14  ;;  %v74_v45 = vmul.f32 %v66_v42, %v48_v14 }
  0xfc   :  { %v262_v47 = vpop.eup %261  ;;  %v80_v48 = vadd.f32 1e-05, %v76_v44  ;;  %v78_v49 = vadd.f32 1e-05, %v74_v45 }
  0xfd   :  { %v264_v50 = vpop.eup %263  ;;  %v82_v51 = vmul.f32 %v262_v47, %v77_v39  ;;  %vm88_vm2 = vweird.f32 %v262_v47 }
  0xfe   :  { %v102_v52 = vmul.f32 %v264_v50, %v79_v40  ;;  %265 = vrsqrt.f32 %v80_v48  ;;  %vm108_vm3 = vweird.f32 %v264_v50  ;;  %vm89_vm5 = vmor %vm87_vm4, %vm88_vm2  ;;  %vm117_vm11 = vweird.f32 %v80_v48 }
  0xff   :  { %v83_v53 = vmul.f32 %v262_v47, %v82_v51  ;;  %267 = vrsqrt.f32 %v78_v49  ;;  %vm109_vm7 = vmor %vm107_vm6, %vm108_vm3  ;;  %vm97_vm13 = vweird.f32 %v78_v49 }
 0x100   :  { %v103_v54 = vmul.f32 %v264_v50, %v102_v52 }
 0x101   :  { %v84_v55 = vmul.f32 0.5, %v83_v53 }
 0x102   :  { %v104_v56 = vmul.f32 0.5, %v103_v54 }
 0x103   :  { %v85_v57 = vsub.f32 1.5, %v84_v55 }
 0x104   :  { %v266_v58 = vpop.eup %265  ;;  %v105_v59 = vsub.f32 1.5, %v104_v56 }
 0x105   :  { %v268_v60 = vpop.eup %267  ;;  %v86_v61 = vmul.f32 %v262_v47, %v85_v57  ;;  %v112_v62 = vmul.f32 %v266_v58, %v80_v48  ;;  %vm118_vm8 = vweird.f32 %v266_v58 }
 0x106   :  { %v106_v0 = vmul.f32 %v264_v50, %v105_v59  ;;  %v92_v1 = vmul.f32 %v268_v60, %v78_v49  ;;  %vm98_vm9 = vweird.f32 %v268_v60  ;;  %vm119_vm12 = vmor %vm117_vm11, %vm118_vm8 }
 0x107   :  { %v90_v2 = vsel %vm89_vm5, %v262_v47, %v86_v61  ;;  %v113_v3 = vmul.f32 %v266_v58, %v112_v62  ;;  %vm99_vm14 = vmor %vm97_vm13, %vm98_vm9 }
 0x108   :  { %v121_v5 = vmul.f32 %v90_v2, %v318_v20  ;;  %v110_v6 = vsel %vm109_vm7, %v264_v50, %v106_v0  ;;  %v93_v7 = vmul.f32 %v268_v60, %v92_v1 }
 0x109   :  { %v123_v8 = vmul.f32 %v110_v6, %v316_v19  ;;  %v114_v9 = vmul.f32 0.5, %v113_v3 }
 0x10a   :  { %v129_v10 = vmul.f32 %v256_v63, %v121_v5  ;;  %v94_v11 = vmul.f32 0.5, %v93_v7 }
 0x10b   :  { %v131_v12 = vmul.f32 %v256_v63, %v123_v8  ;;  %v115_v13 = vsub.f32 1.5, %v114_v9 }
 0x10c   :  { %v137_v14 = vadd.f32 %v257_v4, %v129_v10  ;;  %v95_v15 = vsub.f32 1.5, %v94_v11 }
 0x10d   :  { %v139_v16 = vadd.f32 %v257_v4, %v131_v12  ;;  %v116_v17 = vmul.f32 %v266_v58, %v115_v13 }
 0x10e   :  { %v141_v18 = vpack.c.bf16 %v137_v14, %v137_v14  ;;  %v96_v20 = vmul.f32 %v268_v60, %v95_v15 }
 0x10f   :  { %v143_v21 = vpack.c.bf16 %v139_v16, %v139_v16  ;;  %v120_v22 = vsel %vm119_vm12, %v266_v58, %v116_v17 }
 0x110   :  { %146 = vst.msk [vmem:[#allocation2] sm:$0xf] %vm145_vm10, %v141_v18  ;;  %v124_v19 = vmul.f32 %v120_v22, %v326_v29  ;;  %v100_v23 = vsel %vm99_vm14, %v268_v60, %v96_v20  ;;  %v258_v29 = vld [vmem:[%s376_s4] ss:$0 sm:$0xff] }
 0x111   :  { %148 = vst.msk [vmem:[#allocation2 + $0x8] sm:$0xf] %vm145_vm10, %v143_v21  ;;  %v122_v24 = vmul.f32 %v100_v23, %v328_v30 }
 0x112   :  { %v132_v25 = vmul.f32 %v256_v63, %v124_v19 }
 0x113   :  { %v130_v26 = vmul.f32 %v256_v63, %v122_v24 }
 0x114   :  { %v140_v27 = vadd.f32 %v257_v4, %v132_v25 }
 0x115   :  { %v138_v28 = vadd.f32 %v257_v4, %v130_v26 }
 0x116   :  { %v144_v31 = vpack.c.bf16 %v140_v27, %v140_v27 }
 0x117   :  { %v142_v32 = vpack.c.bf16 %v138_v28, %v138_v28 }
 0x118   :  { %149 = vst.msk [vmem:[#allocation2 + $0xc] sm:$0xf] %vm145_vm10, %v144_v31 }
 0x119   :  { %147 = vst.msk [vmem:[#allocation2 + $0x4] sm:$0xf] %vm145_vm10, %v142_v32 }
 0x11f   :  { %v250_v33 = vld [vmem:[#allocation2 + $0x8] sm:$0xff] }
 0x120   :  { %v249_v34 = vld [vmem:[#allocation2] sm:$0xff]  ;;  %244 = vmatmul.msk.bf16.vlgmr.msra.gmra.mxu1 %vm29_vm0, %v250_v33 }
 0x121   :  { %243 = vmatmul.msk.bf16.vlgmr.msra.gmra.mxu0 %vm29_vm0, %v249_v34 }
 0x19d   :  { %v205_v30 = vpop.f32.mrf.mxu1 }
 0x19e   :  { %v200_v35 = vpop.f32.mrf.mxu0  ;;  %v206_v36 = vadd.f32 %v258_v29, %v205_v30 }
 0x19f   :  { %v201_v37 = vadd.f32 %v258_v29, %v200_v35 }
 0x1a0   :  { %v247_v38 = vclamps-f32 %v206_v36, 1.0 }
 0x1a1   :  { %v245_v39 = vclamps-f32 %v201_v37, 1.0 }
 0x1a2   :  { %221 = vst.msk [vmem:[%s378_s5 + $0x10] sm:$0xff] %vm218_vm15, %v247_v38 }
 0x1a3   :  { %219 = vst.msk [vmem:[%s378_s5] sm:$0xff] %vm218_vm15, %v245_v39 }
 0x1a5   :  { %v207_v40 = vpop.f32.mrf.mxu1 }
 0x1a6   :  { %v202_v41 = vpop.f32.mrf.mxu0  ;;  %v208_v42 = vadd.f32 %v258_v29, %v207_v40 }
 0x1a7   :  { %v203_v43 = vadd.f32 %v258_v29, %v202_v41 }
 0x1a8   :  { %v248_v44 = vclamps-f32 %v208_v42, 1.0 }
 0x1a9   :  { %v246_v45 = vclamps-f32 %v203_v43, 1.0 }
 0x1aa   :  { %222 = vst.msk [vmem:[%s378_s5 + $0x18] sm:$0xff] %vm218_vm15, %v248_v44 }
 0x1ab   :  { %220 = vst.msk [vmem:[%s378_s5 + $0x8] sm:$0xff] %vm218_vm15, %v246_v45 }

// kernel: forward.22
= control target key start
LH: loop header
LB: loop body
LE: loop exit
PB: predicated region body
PF: predicated region fallthrough
CT: control target
= control target key end

     0   :  { %s831_s13 = smov 0   ;;  %s934_s0 = inlined_call_operand.vmem [shape: f32[2,16,32], index: 0, kind: input, shape index: {}]   ;;  %s935_s1 = inlined_call_operand.vmem [shape: f32[1,32], index: 1, kind: input, shape index: {}]   ;;  %s936_s2 = inlined_call_operand.vmem [shape: f32[1,32], index: 2, kind: input, shape index: {}]   ;;  %s937_s3 = inlined_call_operand.vmem [shape: f32[32,4], index: 3, kind: input, shape index: {}]   ;;  %s938_s4 = inlined_call_operand.vmem [shape: f32[1,4], index: 4, kind: input, shape index: {}]   ;;  %s939_s5 = inlined_call_operand.vmem [shape: f32[5,4], index: 5, kind: input, shape index: {}]   ;;  %s940_s6 = inlined_call_operand.vmem [shape: f32[4,32], index: 6, kind: input, shape index: {}]   ;;  %s941_s7 = inlined_call_operand.vmem [shape: f32[1,32], index: 7, kind: input, shape index: {}]   ;;  %s942_s8 = inlined_call_operand.vmem [shape: f32[16,32], index: 8, kind: input, shape index: {}]   ;;  %s943_s9 = inlined_call_operand.vmem [shape: f32[2,16,32], index: 9, kind: output, shape index: {0}]   ;;  %s944_s10 = inlined_call_operand.vmem [shape: s32[2,16,1], index: 10, kind: output, shape index: {1}]  }
   0x1 LB: > { %s686_s14 = sadd.s32 4294967295, %s769_s13   ;;  %p690_p0 = scmp.ge.s32.totalorder %s769_s13, 1  ;;  %s769_s13 = sphi %s831_s13, %s21_s13  }
   0x2   : > { %p315_p1 = scmp.lt.s32.totalorder %s769_s13, 3 }
   0x4   : > { %p316_p2 = pnand %p690_p0, %p315_p1 }
   0x5   : > { %p358_p3 = scmp.lt.s32.totalorder (!%p316_p2), %s686_s14, 1 }
   0x6   : > { %319 = sbr.rel (%p316_p2) target bundleno = 618 (0x26a), region = 56 }
   0xb   : > { %s946_s14 = smov (!%p358_p3, %s686_s14), 1  ;;  %vm375_vm0 = vcmask 261120   ;;  %v771_v4 = vmov 32.0   ;;  %v442_v21 = vld [vmem:[%s937_s3 + $0x18] sm:$0xff]  ;;  %v441_v22 = vld [vmem:[%s937_s3 + $0x10] sm:$0xff]  ;;  %v440_v23 = vld [vmem:[%s937_s3 + $0x8] sm:$0xff] }
   0xc   : > { %s839_s15 = sshll.u32 %s946_s14, 4  ;;  %751 = vrcp.f32 %v771_v4  ;;  %465 = vmatpush.msra.mxu0 %v442_v21  ;;  %704 = vmatpush.msra.mxu1 %v442_v21  ;;  %v439_v24 = vld [vmem:[%s937_s3] sm:$0xff]  ;;  %v772_v54 = vmov 1   ;;  %v773_v55 = vmov 0   ;;  %vm502_vm12 = vcmask 31744  }
   0xd   : > { %s362_s18 = scalar_lea.vmem %s934_s0, %s839_s15  ;;  %v738_v39 = vld [vmem:[%s935_s1] ss:$0 sm:$0xff]  ;;  %v872_v53 = vld [vmem:[%s939_s5 + $0x3] ss:$0 sm:$0xff]  ;;  %733 = vset.pattern.permute.xlu2 %v772_v54  ;;  %731 = vset.pattern.permute.xlu0 %v773_v55  ;;  %v741_v59 = vld [vmem:[%s939_s5 + $0x2] ss:$0 sm:$0xff]  ;;  %s918_s21 = scalar_lea.vmem %s943_s9, %s839_s15 }
   0xe   : > { %v373_v0 = vld [vmem:[%s362_s18] sm:$0xff]  ;;  %v374_v2 = vld [vmem:[%s362_s18 + $0x8] sm:$0xff]  ;;  %466 = vmatpush.msra.mxu0 %v441_v22  ;;  %705 = vmatpush.msra.mxu1 %v441_v22  ;;  %vm519_vm8 = vweird.f32 %v872_v53  ;;  %v525_v4 = vand.u32 2147483648, %v872_v53  ;;  %s372_s24 = scalar_lea.vmem %s944_s10, %s839_s15  ;;  %vm511_vm14 = vcmask 7168  }
   0xf   : > { %v376_v1 = vsel %vm375_vm0, %v373_v0, 0.0  ;;  %v379_v3 = vsel %vm375_vm0, %v374_v2, 0.0  ;;  %v739_v43 = vld [vmem:[%s936_s2] ss:$0 sm:$0xff]  ;;  %732 = vset.pattern.permute.xlu1 %v773_v55 }
  0x10   : > { %377 = vadd.xlane.f32.xlu0 %v376_v1  ;;  %467 = vmatpush.msra.mxu0 %v440_v23  ;;  %v740_v57 = vld [vmem:[%s938_s4] ss:$0 sm:$0xff] }
  0x11   : > { %706 = vmatpush.msra.mxu1 %v440_v23  ;;  %v742_v1 = vld [vmem:[%s939_s5] ss:$0 sm:$0xff] }
  0x12   : > { %v752_v5 = vpop.eup %751  ;;  %468 = vmatpush.msra.mxu0 %v439_v24 }
  0x13   : > { %v383_v6 = vmul.f32 32.0, %v752_v5  ;;  %vm387_vm1 = vweird.f32 %v752_v5  ;;  %707 = vmatpush.msra.mxu1 %v439_v24  ;;  %v774_v24 = vmov 3  }
  0x15   : > { %v384_v7 = vsub.f32 1.0, %v383_v6 }
  0x17   : > { %v385_v8 = vmul.f32 %v752_v5, %v384_v7  ;;  %v523_v7 = vand.u32 2147483647, %v872_v53 }
  0x18   : > { %380 = vadd.xlane.f32.xlu0 %v379_v3 }
  0x19   : > { %v386_v9 = vadd.f32 %v752_v5, %v385_v8  ;;  %vm524_vm11 = vcmp.eq.f32.partialorder %v523_v7, 8.507059e+37 }
  0x1b   : > { %v388_v10 = vsel %vm387_vm1, %v752_v5, %v386_v9  ;;  %v743_v5 = vld [vmem:[%s939_s5 + $0x1] ss:$0 sm:$0xff] }
  0x83   : > { %v378_v11 = vpop.xlane.xlu0 %377 }
  0x84   : > { %v389_v12 = vmul.f32 %v388_v10, %v378_v11  ;;  %v526_v11 = vor.u32 1.1754944e-38, %v525_v4 }
  0x86   : > { %v391_v13 = vsub.f32 %v373_v0, %v389_v12 }
  0x88   : > { %v393_v14 = vmul.f32 %v391_v13, %v391_v13 }
  0x8a   : > { %v395_v15 = vsel %vm375_vm0, %v393_v14, 0.0 }
  0x8b   : > { %396 = vadd.xlane.f32.xlu1 %v395_v15  ;;  %v381_v16 = vpop.xlane.xlu0 %380 }
  0x8c   : > { %v390_v17 = vmul.f32 %v388_v10, %v381_v16 }
  0x8e   : > { %v392_v18 = vsub.f32 %v374_v2, %v390_v17 }
  0x90   : > { %v394_v19 = vmul.f32 %v392_v18, %v392_v18 }
  0x92   : > { %v398_v20 = vsel %vm375_vm0, %v394_v19, 0.0 }
  0x93   : > { %399 = vadd.xlane.f32.xlu1 %v398_v20 }
  0xfe   : > { %v397_v25 = vpop.xlane.xlu1 %396 }
  0xff   : > { %v401_v26 = vmul.f32 %v397_v25, %v388_v10  ;;  %v775_v25 = vmov 2  }
 0x101   : > { %v403_v27 = vadd.f32 1e-05, %v401_v26 }
 0x103   : > { %753 = vrsqrt.f32 %v403_v27  ;;  %vm411_vm3 = vweird.f32 %v403_v27 }
 0x106   : > { %v400_v28 = vpop.xlane.xlu1 %399 }
 0x107   : > { %v402_v29 = vmul.f32 %v400_v28, %v388_v10 }
 0x109   : > { %v754_v30 = vpop.eup %753  ;;  %v404_v31 = vadd.f32 1e-05, %v402_v29 }
 0x10a   : > { %v406_v32 = vmul.f32 %v754_v30, %v403_v27  ;;  %vm412_vm2 = vweird.f32 %v754_v30  ;;  %v745_v27 = vld [vmem:[%s939_s5 + $0x4] ss:$0 sm:$0xff] }
 0x10b   : > { %755 = vrsqrt.f32 %v404_v31  ;;  %vm413_vm4 = vmor %vm411_vm3, %vm412_vm2  ;;  %vm421_vm6 = vweird.f32 %v404_v31 }
 0x10c   : > { %v407_v33 = vmul.f32 %v754_v30, %v406_v32  ;;  %757 = vrcp.f32 %v872_v53 }
 0x10e   : > { %v408_v34 = vmul.f32 0.5, %v407_v33 }
 0x110   : > { %v409_v35 = vsub.f32 1.5, %v408_v34  ;;  %v747_v34 = vld [vmem:[%s941_s7] ss:$0 sm:$0xff] }
 0x111   : > { %v756_v36 = vpop.eup %755 }
 0x112   : > { %v410_v37 = vmul.f32 %v754_v30, %v409_v35  ;;  %v416_v38 = vmul.f32 %v756_v36, %v404_v31  ;;  %vm422_vm5 = vweird.f32 %v756_v36  ;;  %v758_v56 = vpop.eup %757  ;;  %v748_v35 = vld [vmem:[%s940_s6] ss:$0 sm:$0xff] }
 0x113   : > { %vm423_vm7 = vmor %vm421_vm6, %vm422_vm5  ;;  %v515_v58 = vmul.f32 %v758_v56, %v872_v53  ;;  %vm520_vm9 = vweird.f32 %v758_v56 }
 0x114   : > { %v414_v40 = vsel %vm413_vm4, %v754_v30, %v410_v37  ;;  %v417_v41 = vmul.f32 %v756_v36, %v416_v38  ;;  %vm521_vm10 = vmor %vm519_vm8, %vm520_vm9 }
 0x115   : > { %v425_v42 = vmul.f32 %v414_v40, %v391_v13  ;;  %v516_v62 = vsub.f32 1.0, %v515_v58 }
 0x116   : > { %v418_v44 = vmul.f32 0.5, %v417_v41  ;;  %v746_v41 = vld [vmem:[%s940_s6 + $0x1] ss:$0 sm:$0xff] }
 0x117   : > { %v431_v45 = vmul.f32 %v738_v39, %v425_v42  ;;  %v517_v0 = vmul.f32 %v758_v56, %v516_v62  ;;  %v750_v42 = vld [vmem:[%s940_s6 + $0x2] ss:$0 sm:$0xff] }
 0x118   : > { %v419_v46 = vsub.f32 1.5, %v418_v44 }
 0x119   : > { %v437_v47 = vadd.f32 %v739_v43, %v431_v45  ;;  %v518_v6 = vadd.f32 %v758_v56, %v517_v0 }
 0x11a   : > { %v420_v48 = vmul.f32 %v756_v36, %v419_v46 }
 0x11b   : > { %697 = vmatmul.msk.f32.vlgmr.msra.gmra.mxu0 %vm375_vm0, %v437_v47  ;;  %v522_v13 = vsel %vm521_vm10, %v758_v56, %v518_v6  ;;  %v749_v47 = vld [vmem:[%s940_s6 + $0x3] ss:$0 sm:$0xff] }
 0x11c   : > { %v424_v49 = vsel %vm423_vm7, %v756_v36, %v420_v48  ;;  %v527_v15 = vsel %vm524_vm11, %v526_v11, %v522_v13  ;;  %v531_v36 = vld [vmem:[%s942_s8] sm:$0xff] }
 0x11d   : > { %v426_v50 = vmul.f32 %v424_v49, %v392_v18  ;;  %v536_v38 = vadd.f32 %v747_v34, %v531_v36 }
 0x11f   : > { %v432_v51 = vmul.f32 %v738_v39, %v426_v50 }
 0x121   : > { %v438_v52 = vadd.f32 %v739_v43, %v432_v51 }
 0x123   : > { %698 = vmatmul.msk.f32.vlgmr.msra.gmra.mxu1 %vm375_vm0, %v438_v52 }
 0x198   : > { %v470_v60 = vpop.f32.mrf.mxu0 }
 0x199   : > { %v471_v61 = vadd.f32 %v740_v57, %v470_v60 }
 0x19b   : > { %v482_v63 = vadd.f32 %v741_v59, %v471_v61 }
 0x19d   : > { %759 = vtanh.f32 %v482_v63 }
 0x1a0   : > { %v473_v2 = vpop.f32.mrf.mxu1 }
 0x1a1   : > { %v474_v3 = vadd.f32 %v740_v57, %v473_v2 }
 0x1a3   : > { %v760_v8 = vpop.eup %759  ;;  %v483_v9 = vadd.f32 %v741_v59, %v474_v3  ;;  %v532_v59 = vld [vmem:[%s942_s8 + $0x8] sm:$0xff] }
 0x1a4   : > { %v487_v10 = vmul.f32 %v760_v8, %v742_v1  ;;  %v537_v60 = vadd.f32 %v747_v34, %v532_v59 }
 0x1a5   : > { %761 = vtanh.f32 %v483_v9 }
 0x1a6   : > { %v490_v12 = vsub.f32 %v487_v10, %v743_v5 }
 0x1a8   : > { %v492_v14 = vadd.f32 0.5, %v490_v12 }
 0x1aa   : > { %v494_v16 = vfloor.f32 %v492_v14 }
 0x1ab   : > { %v762_v17 = vpop.eup %761 }
 0x1ac   : > { %v488_v18 = vmul.f32 %v762_v17, %v742_v1  ;;  %v528_v19 = vmul.f32 %v527_v15, %v494_v16  ;;  %v497_v26 = vadd.f32 %v872_v53, %v494_v16 }
 0x1ae   : > { %556 = vperm.xlu2 %733, %v528_v19   ;;  %541 = vperm.xlu0 %731, %v528_v19   ;;  %v491_v20 = vsub.f32 %v488_v18, %v743_v5  ;;  %v500_v28 = vmul.f32 %v745_v27, %v497_v26 }
 0x1b0   : > { %v493_v21 = vadd.f32 0.5, %v491_v20  ;;  %v503_v29 = vsel %vm502_vm12, %v500_v28, 0.0 }
 0x1b2   : > { %v495_v22 = vfloor.f32 %v493_v21 }
 0x1b4   : > { %v529_v23 = vmul.f32 %v527_v15, %v495_v22  ;;  %v498_v30 = vadd.f32 %v872_v53, %v495_v22 }
 0x1b6   : > { %737 = vset.pattern.permute.xlu0 %v774_v24  ;;  %560 = vperm.xlu2 %733, %v529_v23   ;;  %v501_v31 = vmul.f32 %v745_v27, %v498_v30 }
 0x1b7   : > { %546 = vperm.xlu1 %732, %v529_v23   ;;  %588 = vperm.xlu0 %737, %v529_v23  }
 0x1b8   : > { %v506_v32 = vsel %vm502_vm12, %v501_v31, 0.0 }
 0x1be   : > { %735 = vset.pattern.permute.xlu2 %v775_v25 }
 0x1bf   : > { %734 = vset.pattern.permute.xlu1 %v775_v25 }
 0x1c0   : > { %570 = vperm.xlu1 %734, %v528_v19  }
 0x1c8   : > { %736 = vset.pattern.permute.xlu1 %v774_v24 }
 0x1c9   : > { %584 = vperm.xlu1 %736, %v528_v19  }
 0x1df   : > { %504 = vadd.xlane.f32.xlu2 %v503_v29 }
 0x1e7   : > { %507 = vadd.xlane.f32.xlu2 %v506_v32 }
 0x1ff   : > { %574 = vperm.xlu2 %735, %v529_v23  }
 0x208   : > { %v557_v43 = vpop.permute.xlu2 %556 }
 0x209   : > { %v564_v45 = vmul.f32 %v746_v41, %v557_v43 }
 0x210   : > { %v561_v53 = vpop.permute.xlu2 %560 }
 0x211   : > { %v565_v4 = vmul.f32 %v746_v41, %v561_v53 }
 0x220   : > { %v542_v37 = vpop.permute.xlu0 %541 }
 0x221   : > { %v550_v39 = vmul.f32 %v748_v35, %v542_v37 }
 0x223   : > { %v552_v44 = vadd.f32 %v550_v39, %v536_v38 }
 0x225   : > { %v566_v48 = vadd.f32 %v564_v45, %v552_v44 }
 0x229   : > { %v547_v33 = vpop.permute.xlu1 %546  ;;  %v589_v5 = vpop.permute.xlu0 %588 }
 0x22a   : > { %v551_v62 = vmul.f32 %v748_v35, %v547_v33  ;;  %v593_v9 = vmul.f32 %v749_v47, %v589_v5 }
 0x22c   : > { %v553_v3 = vadd.f32 %v551_v62, %v537_v60 }
 0x22e   : > { %v567_v7 = vadd.f32 %v565_v4, %v553_v3 }
 0x232   : > { %v571_v40 = vpop.permute.xlu1 %570 }
 0x233   : > { %v578_v46 = vmul.f32 %v750_v42, %v571_v40 }
 0x235   : > { %v580_v50 = vadd.f32 %v578_v46, %v566_v48 }
 0x23b   : > { %v585_v49 = vpop.permute.xlu1 %584 }
 0x23c   : > { %v592_v51 = vmul.f32 %v749_v47, %v585_v49 }
 0x23e   : > { %v594_v52 = vadd.f32 %v592_v51, %v580_v50 }
 0x240   : > { %596 = vst.msk [vmem:[%s918_s21] sm:$0xff] %vm375_vm0, %v594_v52 }
 0x252   : > { %v505_v54 = vpop.xlane.xlu2 %504 }
 0x253   : > { %vm708_vm13 = vcmp.lt.s32.totalorder %v505_v54, 0  ;;  %v709_v55 = vceil.f32 %v505_v54  ;;  %v710_v56 = vfloor.f32 %v505_v54 }
 0x255   : > { %v711_v57 = vsel %vm708_vm13, %v709_v55, %v710_v56 }
 0x256   : > { %v712_v58 = vcvt.f32.s32 %v711_v57 }
 0x258   : > { %512 = vst.msk [vmem:[%s372_s24] sm:$0xff] %vm511_vm14, %v712_v58 }
 0x25a   : > { %v508_v61 = vpop.xlane.xlu2 %507 }
 0x25b   : > { %vm713_vm15 = vcmp.lt.s32.totalorder %v508_v61, 0  ;;  %v714_v63 = vceil.f32 %v508_v61  ;;  %v715_v0 = vfloor.f32 %v508_v61 }
 0x25d   : > { %v716_v1 = vsel %vm713_vm15, %v714_v63, %v715_v0 }
 0x25e   : > { %v717_v2 = vcvt.f32.s32 %v716_v1 }
 0x260   : > { %513 = vst.msk [vmem:[%s372_s24 + $0x8] sm:$0xff] %vm511_vm14, %v717_v2 }
 0x262   : > { %v575_v6 = vpop.permute.xlu2 %574 }
 0x263   : > { %v579_v8 = vmul.f32 %v750_v42, %v575_v6 }
 0x265   : > { %v581_v10 = vadd.f32 %v579_v8, %v567_v7 }
 0x267   : > { %v595_v11 = vadd.f32 %v593_v9, %v581_v10 }
 0x269   : > { %597 = vst.msk [vmem:[%s918_s21 + $0x8] sm:$0xff] %vm375_vm0, %v595_v11 }
 0x26a PF: > { %s21_s13 = sadd.s32 1, %s769_s13  }
 0x26b   : > { %p18_p4 = scmp.ge.s32.totalorder %s21_s13, 4  }
 0x26d   :  { %20 = sbr.rel (!%p18_p4) target bundleno = 1 (0x1), region = 98 }

</bundles_post_ra>
